<compile_context>
chip_gen: v7x
topology: tpu7x:2x2x1
jax: 0.10.0
libtpu: 0.0.40
codegen_flags: <defaults>
</compile_context>

<pallas_src>
import functools

import jax
import jax.numpy as jnp
from jax.experimental import pallas as pl
from jax.experimental.pallas import tpu as pltpu


# ----------------------------------------------------------------------------
# Fused RDB kernel: one batch element per grid step.
# ----------------------------------------------------------------------------
def _rdb_fused_kernel(*refs, G0, G, n_layers, k_size, H, W):
    """refs = (x, mask, w_0, b_0, ..., w_{C-1}, b_{C-1}, w_lff, b_lff,
               out, feat_scratch)

    x_ref    : (1, G0, F)      RDB input, padded + flattened spatial in lanes
    m_ref    : (1, N)          1.0 at real-image columns, 0.0 at pad columns
    w_c      : (K*K, G, Cin_c) one (Cout, Cin) matrix per conv tap
    b_c      : (G, 1)
    w_lff    : (G0, Ctot), b_lff: (G0, 1)
    out_ref  : (1, G0, N)      output on the "valid rows x all Wp cols" grid
    feat_ref : (Ctot, F)       VMEM feature stack (dense connectivity, no concat)
    """
    p = k_size // 2
    Hp, Wp = H + 2 * p, W + 2 * p
    F = Hp * Wp + 2 * p          # flat feature length (+2p corner-tap slack)
    N = H * Wp                   # computed region: H valid rows x Wp columns
    mid = p + p * Wp             # flat offset of the computed region inside F

    n_in = 4 + 2 * n_layers
    x_ref = refs[0]
    m_ref = refs[1]
    layer_refs = refs[2:2 + 2 * n_layers]
    wl_ref = refs[2 + 2 * n_layers]
    bl_ref = refs[3 + 2 * n_layers]
    o_ref = refs[n_in]
    feat_ref = refs[n_in + 1]

    # Stage the RDB input into the VMEM feature stack; zero everything else so
    # the 'same' zero-padding (pad rows/cols) is exact for every layer.
    feat_ref[...] = jnp.zeros_like(feat_ref)
    feat_ref[pl.ds(0, G0), pl.ds(0, F)] = x_ref[0].astype(jnp.float32)

    mask = m_ref[...]            # (1, N)

    # Dense conv(KxK) + ReLU layers.  Dense connectivity == just reading a
    # larger channel slab of the resident stack; no concatenation.
    for c in range(n_layers):
        w_ref = layer_refs[2 * c]
        b_ref = layer_refs[2 * c + 1]
        cin = G0 + c * G
        acc = jnp.zeros((G, N), jnp.float32)
        t = 0
        for dy in range(-p, p + 1):
            for dx in range(-p, p + 1):
                # Each tap is a contiguous lane slice of the padded flat row.
                start = mid + dy * Wp + dx
                xs = feat_ref[pl.ds(0, cin), pl.ds(start, N)]
                acc = acc + jnp.dot(w_ref[t], xs,
                                    preferred_element_type=jnp.float32)
                t += 1
        acc = jnp.maximum(acc + b_ref[...], 0.0)
        acc = acc * mask         # keep pad columns exactly zero for next layer
        feat_ref[pl.ds(G0 + c * G, G), pl.ds(mid, N)] = acc

    # LFF (1x1 conv over the whole stack) + local residual (x0 channels).
    ctot = G0 + n_layers * G
    fall = feat_ref[pl.ds(0, ctot), pl.ds(mid, N)]
    y = jnp.dot(wl_ref[...], fall, preferred_element_type=jnp.float32)
    y = y + bl_ref[...] + feat_ref[pl.ds(0, G0), pl.ds(mid, N)]
    o_ref[0] = y.astype(o_ref.dtype)


# ----------------------------------------------------------------------------
# Pallas-call wrapper (consumes NCHW directly)
# ----------------------------------------------------------------------------
def _rdb_pallas(x, conv_ws, conv_bs, w_lff, b_lff):
    B, G0, H, W = x.shape
    n_layers = len(conv_ws)
    G = conv_ws[0].shape[0]          # OIHW
    k_size = conv_ws[0].shape[2]
    p = k_size // 2
    Hp, Wp = H + 2 * p, W + 2 * p
    F = Hp * Wp + 2 * p
    N = H * Wp
    Ctot = G0 + n_layers * G

    # Pad ONLY the small RDB input once, flatten spatial into the lane axis.
    xp = jnp.pad(x, ((0, 0), (0, 0), (p, p), (p, p))).reshape(B, G0, Hp * Wp)
    xp = jnp.pad(xp, ((0, 0), (0, 0), (p, p)))          # (B, G0, F)

    # Column-validity mask (zero at the horizontal pad columns of each row).
    col = jnp.arange(Wp, dtype=jnp.int32)
    col_ok = jnp.logical_and(col >= p, col < p + W).astype(jnp.float32)
    mask = jnp.tile(col_ok, (H,)).reshape(1, N)

    kern_inputs = [xp, mask]
    in_specs = [
        pl.BlockSpec((1, G0, F), lambda b: (b, 0, 0)),
        pl.BlockSpec((1, N), lambda b: (0, 0)),
    ]
    for w, bb in zip(conv_ws, conv_bs):
        cin = w.shape[1]
        # OIHW -> (K*K, Cout, Cin): one (Cout, Cin) matrix per tap.
        wk = jnp.transpose(w, (2, 3, 0, 1)).reshape(k_size * k_size, G, cin)
        kern_inputs += [wk, bb.reshape(G, 1)]
        in_specs += [
            pl.BlockSpec((k_size * k_size, G, cin), lambda b: (0, 0, 0)),
            pl.BlockSpec((G, 1), lambda b: (0, 0)),
        ]
    kern_inputs += [w_lff, b_lff.reshape(G0, 1)]
    in_specs += [
        pl.BlockSpec((G0, Ctot), lambda b: (0, 0)),
        pl.BlockSpec((G0, 1), lambda b: (0, 0)),
    ]

    kernel = functools.partial(
        _rdb_fused_kernel, G0=G0, G=G, n_layers=n_layers,
        k_size=k_size, H=H, W=W)

    y_flat = pl.pallas_call(
        kernel,
        out_shape=jax.ShapeDtypeStruct((B, G0, N), x.dtype),
        grid_spec=pltpu.PrefetchScalarGridSpec(
            num_scalar_prefetch=0,
            grid=(B,),
            in_specs=in_specs,
            out_specs=pl.BlockSpec((1, G0, N), lambda b: (b, 0, 0)),
            scratch_shapes=[pltpu.VMEM((Ctot, F), jnp.float32)],
        ),
        compiler_params=pltpu.CompilerParams(
            dimension_semantics=("parallel",),
        ),
    )(*kern_inputs)

    # Drop the horizontal pad columns (wrapper-side layout plumbing only).
    return y_flat.reshape(B, G0, H, Wp)[:, :, :, p:p + W]


# ----------------------------------------------------------------------------
# ResidualDenseBlock: parameter init + forward
# ----------------------------------------------------------------------------
def init_rdb_params(key, growth_rate0, growth_rate, n_conv_layers, k_size):
    """Synthetic params with the same shapes as the PyTorch module (OIHW)."""
    params = {"convs": []}
    for c in range(n_conv_layers):
        cin = growth_rate0 + c * growth_rate
        key, kw, kb = jax.random.split(key, 3)
        w = jax.random.normal(kw, (growth_rate, cin, k_size, k_size),
                              jnp.float32) * 0.05
        b = jax.random.normal(kb, (growth_rate,), jnp.float32) * 0.05
        params["convs"].append((w, b))
    cin_lff = growth_rate0 + n_conv_layers * growth_rate
    key, kw, kb = jax.random.split(key, 3)
    params["lff_w"] = jax.random.normal(kw, (growth_rate0, cin_lff),
                                        jnp.float32) * 0.05
    params["lff_b"] = jax.random.normal(kb, (growth_rate0,), jnp.float32) * 0.05
    return params


@jax.jit
def residual_dense_block(params, x_nchw):
    """Forward pass.  x_nchw: (B, G0, H, W) -> (B, G0, H, W)."""
    conv_ws = [w for (w, _) in params["convs"]]
    conv_bs = [b for (_, b) in params["convs"]]
    return _rdb_pallas(x_nchw, conv_ws, conv_bs,
                       params["lff_w"], params["lff_b"])


# ----------------------------------------------------------------------------
# Pure-JAX reference (correctness check)
# ----------------------------------------------------------------------------
def _reference_rdb(params, x):
    feat = x
    for (w, b) in params["convs"]:
        out = jax.lax.conv_general_dilated(
            feat, w, window_strides=(1, 1), padding="SAME",
            dimension_numbers=("NCHW", "OIHW", "NCHW"))
        out = jnp.maximum(out + b[None, :, None, None], 0.0)
        feat = jnp.concatenate([feat, out], axis=1)
    y = jnp.einsum("bchw,oc->bohw", feat, params["lff_w"])
    y = y + params["lff_b"][None, :, None, None] + x
    return y


if __name__ == "__main__":
    # Small, module-consistent config: growth_rate0 = 8 (RDB in/out channels),
    # growth_rate = 8, n_conv_layers = 3, k_size = 3, batch = 2, spatial 16x16.
    G0, G, C, K = 8, 8, 3, 3
    B, H, W = 2, 16, 16

    key = jax.random.PRNGKey(0)
    key, kx = jax.random.split(key)
    x = jax.random.normal(kx, (B, G0, H, W), jnp.float32)  # NCHW, like PyTorch

    params = init_rdb_params(key, G0, G, C, K)

    y = jax.block_until_ready(residual_dense_block(params, x))
    y_ref = jax.block_until_ready(_reference_rdb(params, x))

    assert y.shape == (B, G0, H, W), y.shape
    max_err = float(jnp.max(jnp.abs(y - y_ref)))
    assert max_err < 1e-3, max_err

    print("KERNEL_OK")
</pallas_src>

<mosaic_0001>
module attributes {stable_mosaic.version = 11 : i64} {
  func.func @_rdb_fused_kernel(%arg0: i32, %arg1: memref<1x8x326xf32, #tpu.memory_space<vmem>>, %arg2: memref<1x288xf32, #tpu.memory_space<vmem>>, %arg3: memref<9x8x8xf32, #tpu.memory_space<vmem>>, %arg4: memref<8x1xf32, #tpu.memory_space<vmem>>, %arg5: memref<9x8x16xf32, #tpu.memory_space<vmem>>, %arg6: memref<8x1xf32, #tpu.memory_space<vmem>>, %arg7: memref<9x8x24xf32, #tpu.memory_space<vmem>>, %arg8: memref<8x1xf32, #tpu.memory_space<vmem>>, %arg9: memref<8x32xf32, #tpu.memory_space<vmem>>, %arg10: memref<8x1xf32, #tpu.memory_space<vmem>>, %arg11: memref<1x8x288xf32, #tpu.memory_space<vmem>>, %arg12: memref<32x326xf32, #tpu.memory_space<vmem>>) attributes {dimension_semantics = [#tpu.dimension_semantics<parallel>], iteration_bounds = array<i64: 2>, scalar_prefetch = 0 : i64, scratch_operands = 1 : i64, tpu.core_type = #tpu.core_type<tc>, window_params = [{transform_indices = @transform_0, window_bounds = array<i64: 1, 8, 326>}, {pipeline_mode = #tpu.pipeline_mode<synchronous>, transform_indices = @transform_1, window_bounds = array<i64: 1, 288>}, {pipeline_mode = #tpu.pipeline_mode<synchronous>, transform_indices = @transform_2, window_bounds = array<i64: 9, 8, 8>}, {pipeline_mode = #tpu.pipeline_mode<synchronous>, transform_indices = @transform_3, window_bounds = array<i64: 8, 1>}, {pipeline_mode = #tpu.pipeline_mode<synchronous>, transform_indices = @transform_4, window_bounds = array<i64: 9, 8, 16>}, {pipeline_mode = #tpu.pipeline_mode<synchronous>, transform_indices = @transform_5, window_bounds = array<i64: 8, 1>}, {pipeline_mode = #tpu.pipeline_mode<synchronous>, transform_indices = @transform_6, window_bounds = array<i64: 9, 8, 24>}, {pipeline_mode = #tpu.pipeline_mode<synchronous>, transform_indices = @transform_7, window_bounds = array<i64: 8, 1>}, {pipeline_mode = #tpu.pipeline_mode<synchronous>, transform_indices = @transform_8, window_bounds = array<i64: 8, 32>}, {pipeline_mode = #tpu.pipeline_mode<synchronous>, transform_indices = @transform_9, window_bounds = array<i64: 8, 1>}, {transform_indices = @transform_10, window_bounds = array<i64: 1, 8, 288>}]} {
    %cst = arith.constant 0.000000e+00 : f32
    %0 = vector.broadcast %cst : f32 to vector<32x326xf32>
    %c0 = arith.constant 0 : index
    %c0_0 = arith.constant 0 : index
    %1 = vector.load %arg12[%c0, %c0_0] : memref<32x326xf32, #tpu.memory_space<vmem>>, vector<32x326xf32>
    tpu.vector_store %arg12[%c0, %c0_0], %0 {strides = array<i32>} : memref<32x326xf32, #tpu.memory_space<vmem>>, vector<32x326xf32>,
    %c0_1 = arith.constant 0 : index
    %c0_2 = arith.constant 0 : index
    %c0_3 = arith.constant 0 : index
    %2 = vector.load %arg1[%c0_1, %c0_2, %c0_3] : memref<1x8x326xf32, #tpu.memory_space<vmem>>, vector<1x8x326xf32>
    %3 = vector.shape_cast %2 : vector<1x8x326xf32> to vector<8x326xf32>
    %c0_4 = arith.constant 0 : index
    %c0_5 = arith.constant 0 : index
    %4 = vector.load %arg12[%c0_4, %c0_5] : memref<32x326xf32, #tpu.memory_space<vmem>>, vector<8x326xf32>
    tpu.vector_store %arg12[%c0_4, %c0_5], %3 {strides = array<i32>} : memref<32x326xf32, #tpu.memory_space<vmem>>, vector<8x326xf32>,
    %c0_6 = arith.constant 0 : index
    %c0_7 = arith.constant 0 : index
    %5 = vector.load %arg2[%c0_6, %c0_7] : memref<1x288xf32, #tpu.memory_space<vmem>>, vector<1x288xf32>
    %cst_8 = arith.constant 0.000000e+00 : f32
    %6 = vector.broadcast %cst_8 : f32 to vector<8x288xf32>
    %c0_9 = arith.constant 0 : index
    %c0_10 = arith.constant 0 : index
    %7 = vector.load %arg12[%c0_9, %c0_10] : memref<32x326xf32, #tpu.memory_space<vmem>>, vector<8x288xf32>
    %c0_11 = arith.constant 0 : index
    %c0_12 = arith.constant 0 : index
    %c0_13 = arith.constant 0 : index
    %8 = vector.load %arg3[%c0_11, %c0_12, %c0_13] : memref<9x8x8xf32, #tpu.memory_space<vmem>>, vector<1x8x8xf32>
    %9 = vector.shape_cast %8 : vector<1x8x8xf32> to vector<8x8xf32>
    %cst_14 = arith.constant dense<0.000000e+00> : vector<8x288xf32>
    %10 = tpu.matmul %9, %7, %cst_14 {dimension_numbers = #tpu.dot_dimension_numbers<[1], [0], [0], [1], [0, 0, 1, 1], [], []>} : vector<8x8xf32>, vector<8x288xf32>, vector<8x288xf32> -> vector<8x288xf32>
    %11 = arith.addf %6, %10 : vector<8x288xf32>
    %c0_15 = arith.constant 0 : index
    %c1 = arith.constant 1 : index
    %12 = vector.load %arg12[%c0_15, %c1] : memref<32x326xf32, #tpu.memory_space<vmem>>, vector<8x288xf32>
    %c1_16 = arith.constant 1 : index
    %c0_17 = arith.constant 0 : index
    %c0_18 = arith.constant 0 : index
    %13 = vector.load %arg3[%c1_16, %c0_17, %c0_18] : memref<9x8x8xf32, #tpu.memory_space<vmem>>, vector<1x8x8xf32>
    %14 = vector.shape_cast %13 : vector<1x8x8xf32> to vector<8x8xf32>
    %cst_19 = arith.constant dense<0.000000e+00> : vector<8x288xf32>
    %15 = tpu.matmul %14, %12, %cst_19 {dimension_numbers = #tpu.dot_dimension_numbers<[1], [0], [0], [1], [0, 0, 1, 1], [], []>} : vector<8x8xf32>, vector<8x288xf32>, vector<8x288xf32> -> vector<8x288xf32>
    %16 = arith.addf %11, %15 : vector<8x288xf32>
    %c0_20 = arith.constant 0 : index
    %c2 = arith.constant 2 : index
    %17 = vector.load %arg12[%c0_20, %c2] : memref<32x326xf32, #tpu.memory_space<vmem>>, vector<8x288xf32>
    %c2_21 = arith.constant 2 : index
    %c0_22 = arith.constant 0 : index
    %c0_23 = arith.constant 0 : index
    %18 = vector.load %arg3[%c2_21, %c0_22, %c0_23] : memref<9x8x8xf32, #tpu.memory_space<vmem>>, vector<1x8x8xf32>
    %19 = vector.shape_cast %18 : vector<1x8x8xf32> to vector<8x8xf32>
    %cst_24 = arith.constant dense<0.000000e+00> : vector<8x288xf32>
    %20 = tpu.matmul %19, %17, %cst_24 {dimension_numbers = #tpu.dot_dimension_numbers<[1], [0], [0], [1], [0, 0, 1, 1], [], []>} : vector<8x8xf32>, vector<8x288xf32>, vector<8x288xf32> -> vector<8x288xf32>
    %21 = arith.addf %16, %20 : vector<8x288xf32>
    %c0_25 = arith.constant 0 : index
    %c18 = arith.constant 18 : index
    %22 = vector.load %arg12[%c0_25, %c18] : memref<32x326xf32, #tpu.memory_space<vmem>>, vector<8x288xf32>
    %c3 = arith.constant 3 : index
    %c0_26 = arith.constant 0 : index
    %c0_27 = arith.constant 0 : index
    %23 = vector.load %arg3[%c3, %c0_26, %c0_27] : memref<9x8x8xf32, #tpu.memory_space<vmem>>, vector<1x8x8xf32>
    %24 = vector.shape_cast %23 : vector<1x8x8xf32> to vector<8x8xf32>
    %cst_28 = arith.constant dense<0.000000e+00> : vector<8x288xf32>
    %25 = tpu.matmul %24, %22, %cst_28 {dimension_numbers = #tpu.dot_dimension_numbers<[1], [0], [0], [1], [0, 0, 1, 1], [], []>} : vector<8x8xf32>, vector<8x288xf32>, vector<8x288xf32> -> vector<8x288xf32>
    %26 = arith.addf %21, %25 : vector<8x288xf32>
    %c0_29 = arith.constant 0 : index
    %c19 = arith.constant 19 : index
    %27 = vector.load %arg12[%c0_29, %c19] : memref<32x326xf32, #tpu.memory_space<vmem>>, vector<8x288xf32>
    %c4 = arith.constant 4 : index
    %c0_30 = arith.constant 0 : index
    %c0_31 = arith.constant 0 : index
    %28 = vector.load %arg3[%c4, %c0_30, %c0_31] : memref<9x8x8xf32, #tpu.memory_space<vmem>>, vector<1x8x8xf32>
    %29 = vector.shape_cast %28 : vector<1x8x8xf32> to vector<8x8xf32>
    %cst_32 = arith.constant dense<0.000000e+00> : vector<8x288xf32>
    %30 = tpu.matmul %29, %27, %cst_32 {dimension_numbers = #tpu.dot_dimension_numbers<[1], [0], [0], [1], [0, 0, 1, 1], [], []>} : vector<8x8xf32>, vector<8x288xf32>, vector<8x288xf32> -> vector<8x288xf32>
    %31 = arith.addf %26, %30 : vector<8x288xf32>
    %c0_33 = arith.constant 0 : index
    %c20 = arith.constant 20 : index
    %32 = vector.load %arg12[%c0_33, %c20] : memref<32x326xf32, #tpu.memory_space<vmem>>, vector<8x288xf32>
    %c5 = arith.constant 5 : index
    %c0_34 = arith.constant 0 : index
    %c0_35 = arith.constant 0 : index
    %33 = vector.load %arg3[%c5, %c0_34, %c0_35] : memref<9x8x8xf32, #tpu.memory_space<vmem>>, vector<1x8x8xf32>
    %34 = vector.shape_cast %33 : vector<1x8x8xf32> to vector<8x8xf32>
    %cst_36 = arith.constant dense<0.000000e+00> : vector<8x288xf32>
    %35 = tpu.matmul %34, %32, %cst_36 {dimension_numbers = #tpu.dot_dimension_numbers<[1], [0], [0], [1], [0, 0, 1, 1], [], []>} : vector<8x8xf32>, vector<8x288xf32>, vector<8x288xf32> -> vector<8x288xf32>
    %36 = arith.addf %31, %35 : vector<8x288xf32>
    %c0_37 = arith.constant 0 : index
    %c36 = arith.constant 36 : index
    %37 = vector.load %arg12[%c0_37, %c36] : memref<32x326xf32, #tpu.memory_space<vmem>>, vector<8x288xf32>
    %c6 = arith.constant 6 : index
    %c0_38 = arith.constant 0 : index
    %c0_39 = arith.constant 0 : index
    %38 = vector.load %arg3[%c6, %c0_38, %c0_39] : memref<9x8x8xf32, #tpu.memory_space<vmem>>, vector<1x8x8xf32>
    %39 = vector.shape_cast %38 : vector<1x8x8xf32> to vector<8x8xf32>
    %cst_40 = arith.constant dense<0.000000e+00> : vector<8x288xf32>
    %40 = tpu.matmul %39, %37, %cst_40 {dimension_numbers = #tpu.dot_dimension_numbers<[1], [0], [0], [1], [0, 0, 1, 1], [], []>} : vector<8x8xf32>, vector<8x288xf32>, vector<8x288xf32> -> vector<8x288xf32>
    %41 = arith.addf %36, %40 : vector<8x288xf32>
    %c0_41 = arith.constant 0 : index
    %c37 = arith.constant 37 : index
    %42 = vector.load %arg12[%c0_41, %c37] : memref<32x326xf32, #tpu.memory_space<vmem>>, vector<8x288xf32>
    %c7 = arith.constant 7 : index
    %c0_42 = arith.constant 0 : index
    %c0_43 = arith.constant 0 : index
    %43 = vector.load %arg3[%c7, %c0_42, %c0_43] : memref<9x8x8xf32, #tpu.memory_space<vmem>>, vector<1x8x8xf32>
    %44 = vector.shape_cast %43 : vector<1x8x8xf32> to vector<8x8xf32>
    %cst_44 = arith.constant dense<0.000000e+00> : vector<8x288xf32>
    %45 = tpu.matmul %44, %42, %cst_44 {dimension_numbers = #tpu.dot_dimension_numbers<[1], [0], [0], [1], [0, 0, 1, 1], [], []>} : vector<8x8xf32>, vector<8x288xf32>, vector<8x288xf32> -> vector<8x288xf32>
    %46 = arith.addf %41, %45 : vector<8x288xf32>
    %c0_45 = arith.constant 0 : index
    %c38 = arith.constant 38 : index
    %47 = vector.load %arg12[%c0_45, %c38] : memref<32x326xf32, #tpu.memory_space<vmem>>, vector<8x288xf32>
    %c8 = arith.constant 8 : index
    %c0_46 = arith.constant 0 : index
    %c0_47 = arith.constant 0 : index
    %48 = vector.load %arg3[%c8, %c0_46, %c0_47] : memref<9x8x8xf32, #tpu.memory_space<vmem>>, vector<1x8x8xf32>
    %49 = vector.shape_cast %48 : vector<1x8x8xf32> to vector<8x8xf32>
    %cst_48 = arith.constant dense<0.000000e+00> : vector<8x288xf32>
    %50 = tpu.matmul %49, %47, %cst_48 {dimension_numbers = #tpu.dot_dimension_numbers<[1], [0], [0], [1], [0, 0, 1, 1], [], []>} : vector<8x8xf32>, vector<8x288xf32>, vector<8x288xf32> -> vector<8x288xf32>
    %51 = arith.addf %46, %50 : vector<8x288xf32>
    %c0_49 = arith.constant 0 : index
    %c0_50 = arith.constant 0 : index
    %52 = vector.load %arg4[%c0_49, %c0_50] : memref<8x1xf32, #tpu.memory_space<vmem>>, vector<8x1xf32>
    %53 = vector.broadcast %52 : vector<8x1xf32> to vector<8x288xf32>
    %54 = arith.addf %51, %53 : vector<8x288xf32>
    %cst_51 = arith.constant 0.000000e+00 : f32
    %55 = vector.broadcast %cst_51 : f32 to vector<8x288xf32>
    %56 = arith.maximumf %54, %55 : vector<8x288xf32>
    %57 = vector.broadcast %5 : vector<1x288xf32> to vector<8x288xf32>
    %58 = arith.mulf %56, %57 : vector<8x288xf32>
    %c8_52 = arith.constant 8 : index
    %c19_53 = arith.constant 19 : index
    %59 = vector.load %arg12[%c8_52, %c19_53] : memref<32x326xf32, #tpu.memory_space<vmem>>, vector<8x288xf32>
    tpu.vector_store %arg12[%c8_52, %c19_53], %58 {strides = array<i32>} : memref<32x326xf32, #tpu.memory_space<vmem>>, vector<8x288xf32>,
    %cst_54 = arith.constant 0.000000e+00 : f32
    %60 = vector.broadcast %cst_54 : f32 to vector<8x288xf32>
    %c0_55 = arith.constant 0 : index
    %c0_56 = arith.constant 0 : index
    %61 = vector.load %arg12[%c0_55, %c0_56] : memref<32x326xf32, #tpu.memory_space<vmem>>, vector<16x288xf32>
    %c0_57 = arith.constant 0 : index
    %c0_58 = arith.constant 0 : index
    %c0_59 = arith.constant 0 : index
    %62 = vector.load %arg5[%c0_57, %c0_58, %c0_59] : memref<9x8x16xf32, #tpu.memory_space<vmem>>, vector<1x8x16xf32>
    %63 = vector.shape_cast %62 : vector<1x8x16xf32> to vector<8x16xf32>
    %cst_60 = arith.constant dense<0.000000e+00> : vector<8x288xf32>
    %64 = tpu.matmul %63, %61, %cst_60 {dimension_numbers = #tpu.dot_dimension_numbers<[1], [0], [0], [1], [0, 0, 1, 1], [], []>} : vector<8x16xf32>, vector<16x288xf32>, vector<8x288xf32> -> vector<8x288xf32>
    %65 = arith.addf %60, %64 : vector<8x288xf32>
    %c0_61 = arith.constant 0 : index
    %c1_62 = arith.constant 1 : index
    %66 = vector.load %arg12[%c0_61, %c1_62] : memref<32x326xf32, #tpu.memory_space<vmem>>, vector<16x288xf32>
    %c1_63 = arith.constant 1 : index
    %c0_64 = arith.constant 0 : index
    %c0_65 = arith.constant 0 : index
    %67 = vector.load %arg5[%c1_63, %c0_64, %c0_65] : memref<9x8x16xf32, #tpu.memory_space<vmem>>, vector<1x8x16xf32>
    %68 = vector.shape_cast %67 : vector<1x8x16xf32> to vector<8x16xf32>
    %cst_66 = arith.constant dense<0.000000e+00> : vector<8x288xf32>
    %69 = tpu.matmul %68, %66, %cst_66 {dimension_numbers = #tpu.dot_dimension_numbers<[1], [0], [0], [1], [0, 0, 1, 1], [], []>} : vector<8x16xf32>, vector<16x288xf32>, vector<8x288xf32> -> vector<8x288xf32>
    %70 = arith.addf %65, %69 : vector<8x288xf32>
    %c0_67 = arith.constant 0 : index
    %c2_68 = arith.constant 2 : index
    %71 = vector.load %arg12[%c0_67, %c2_68] : memref<32x326xf32, #tpu.memory_space<vmem>>, vector<16x288xf32>
    %c2_69 = arith.constant 2 : index
    %c0_70 = arith.constant 0 : index
    %c0_71 = arith.constant 0 : index
    %72 = vector.load %arg5[%c2_69, %c0_70, %c0_71] : memref<9x8x16xf32, #tpu.memory_space<vmem>>, vector<1x8x16xf32>
    %73 = vector.shape_cast %72 : vector<1x8x16xf32> to vector<8x16xf32>
    %cst_72 = arith.constant dense<0.000000e+00> : vector<8x288xf32>
    %74 = tpu.matmul %73, %71, %cst_72 {dimension_numbers = #tpu.dot_dimension_numbers<[1], [0], [0], [1], [0, 0, 1, 1], [], []>} : vector<8x16xf32>, vector<16x288xf32>, vector<8x288xf32> -> vector<8x288xf32>
    %75 = arith.addf %70, %74 : vector<8x288xf32>
    %c0_73 = arith.constant 0 : index
    %c18_74 = arith.constant 18 : index
    %76 = vector.load %arg12[%c0_73, %c18_74] : memref<32x326xf32, #tpu.memory_space<vmem>>, vector<16x288xf32>
    %c3_75 = arith.constant 3 : index
    %c0_76 = arith.constant 0 : index
    %c0_77 = arith.constant 0 : index
    %77 = vector.load %arg5[%c3_75, %c0_76, %c0_77] : memref<9x8x16xf32, #tpu.memory_space<vmem>>, vector<1x8x16xf32>
    %78 = vector.shape_cast %77 : vector<1x8x16xf32> to vector<8x16xf32>
    %cst_78 = arith.constant dense<0.000000e+00> : vector<8x288xf32>
    %79 = tpu.matmul %78, %76, %cst_78 {dimension_numbers = #tpu.dot_dimension_numbers<[1], [0], [0], [1], [0, 0, 1, 1], [], []>} : vector<8x16xf32>, vector<16x288xf32>, vector<8x288xf32> -> vector<8x288xf32>
    %80 = arith.addf %75, %79 : vector<8x288xf32>
    %c0_79 = arith.constant 0 : index
    %c19_80 = arith.constant 19 : index
    %81 = vector.load %arg12[%c0_79, %c19_80] : memref<32x326xf32, #tpu.memory_space<vmem>>, vector<16x288xf32>
    %c4_81 = arith.constant 4 : index
    %c0_82 = arith.constant 0 : index
    %c0_83 = arith.constant 0 : index
    %82 = vector.load %arg5[%c4_81, %c0_82, %c0_83] : memref<9x8x16xf32, #tpu.memory_space<vmem>>, vector<1x8x16xf32>
    %83 = vector.shape_cast %82 : vector<1x8x16xf32> to vector<8x16xf32>
    %cst_84 = arith.constant dense<0.000000e+00> : vector<8x288xf32>
    %84 = tpu.matmul %83, %81, %cst_84 {dimension_numbers = #tpu.dot_dimension_numbers<[1], [0], [0], [1], [0, 0, 1, 1], [], []>} : vector<8x16xf32>, vector<16x288xf32>, vector<8x288xf32> -> vector<8x288xf32>
    %85 = arith.addf %80, %84 : vector<8x288xf32>
    %c0_85 = arith.constant 0 : index
    %c20_86 = arith.constant 20 : index
    %86 = vector.load %arg12[%c0_85, %c20_86] : memref<32x326xf32, #tpu.memory_space<vmem>>, vector<16x288xf32>
    %c5_87 = arith.constant 5 : index
    %c0_88 = arith.constant 0 : index
    %c0_89 = arith.constant 0 : index
    %87 = vector.load %arg5[%c5_87, %c0_88, %c0_89] : memref<9x8x16xf32, #tpu.memory_space<vmem>>, vector<1x8x16xf32>
    %88 = vector.shape_cast %87 : vector<1x8x16xf32> to vector<8x16xf32>
    %cst_90 = arith.constant dense<0.000000e+00> : vector<8x288xf32>
    %89 = tpu.matmul %88, %86, %cst_90 {dimension_numbers = #tpu.dot_dimension_numbers<[1], [0], [0], [1], [0, 0, 1, 1], [], []>} : vector<8x16xf32>, vector<16x288xf32>, vector<8x288xf32> -> vector<8x288xf32>
    %90 = arith.addf %85, %89 : vector<8x288xf32>
    %c0_91 = arith.constant 0 : index
    %c36_92 = arith.constant 36 : index
    %91 = vector.load %arg12[%c0_91, %c36_92] : memref<32x326xf32, #tpu.memory_space<vmem>>, vector<16x288xf32>
    %c6_93 = arith.constant 6 : index
    %c0_94 = arith.constant 0 : index
    %c0_95 = arith.constant 0 : index
    %92 = vector.load %arg5[%c6_93, %c0_94, %c0_95] : memref<9x8x16xf32, #tpu.memory_space<vmem>>, vector<1x8x16xf32>
    %93 = vector.shape_cast %92 : vector<1x8x16xf32> to vector<8x16xf32>
    %cst_96 = arith.constant dense<0.000000e+00> : vector<8x288xf32>
    %94 = tpu.matmul %93, %91, %cst_96 {dimension_numbers = #tpu.dot_dimension_numbers<[1], [0], [0], [1], [0, 0, 1, 1], [], []>} : vector<8x16xf32>, vector<16x288xf32>, vector<8x288xf32> -> vector<8x288xf32>
    %95 = arith.addf %90, %94 : vector<8x288xf32>
    %c0_97 = arith.constant 0 : index
    %c37_98 = arith.constant 37 : index
    %96 = vector.load %arg12[%c0_97, %c37_98] : memref<32x326xf32, #tpu.memory_space<vmem>>, vector<16x288xf32>
    %c7_99 = arith.constant 7 : index
    %c0_100 = arith.constant 0 : index
    %c0_101 = arith.constant 0 : index
    %97 = vector.load %arg5[%c7_99, %c0_100, %c0_101] : memref<9x8x16xf32, #tpu.memory_space<vmem>>, vector<1x8x16xf32>
    %98 = vector.shape_cast %97 : vector<1x8x16xf32> to vector<8x16xf32>
    %cst_102 = arith.constant dense<0.000000e+00> : vector<8x288xf32>
    %99 = tpu.matmul %98, %96, %cst_102 {dimension_numbers = #tpu.dot_dimension_numbers<[1], [0], [0], [1], [0, 0, 1, 1], [], []>} : vector<8x16xf32>, vector<16x288xf32>, vector<8x288xf32> -> vector<8x288xf32>
    %100 = arith.addf %95, %99 : vector<8x288xf32>
    %c0_103 = arith.constant 0 : index
    %c38_104 = arith.constant 38 : index
    %101 = vector.load %arg12[%c0_103, %c38_104] : memref<32x326xf32, #tpu.memory_space<vmem>>, vector<16x288xf32>
    %c8_105 = arith.constant 8 : index
    %c0_106 = arith.constant 0 : index
    %c0_107 = arith.constant 0 : index
    %102 = vector.load %arg5[%c8_105, %c0_106, %c0_107] : memref<9x8x16xf32, #tpu.memory_space<vmem>>, vector<1x8x16xf32>
    %103 = vector.shape_cast %102 : vector<1x8x16xf32> to vector<8x16xf32>
    %cst_108 = arith.constant dense<0.000000e+00> : vector<8x288xf32>
    %104 = tpu.matmul %103, %101, %cst_108 {dimension_numbers = #tpu.dot_dimension_numbers<[1], [0], [0], [1], [0, 0, 1, 1], [], []>} : vector<8x16xf32>, vector<16x288xf32>, vector<8x288xf32> -> vector<8x288xf32>
    %105 = arith.addf %100, %104 : vector<8x288xf32>
    %c0_109 = arith.constant 0 : index
    %c0_110 = arith.constant 0 : index
    %106 = vector.load %arg6[%c0_109, %c0_110] : memref<8x1xf32, #tpu.memory_space<vmem>>, vector<8x1xf32>
    %107 = vector.broadcast %106 : vector<8x1xf32> to vector<8x288xf32>
    %108 = arith.addf %105, %107 : vector<8x288xf32>
    %cst_111 = arith.constant 0.000000e+00 : f32
    %109 = vector.broadcast %cst_111 : f32 to vector<8x288xf32>
    %110 = arith.maximumf %108, %109 : vector<8x288xf32>
    %111 = vector.broadcast %5 : vector<1x288xf32> to vector<8x288xf32>
    %112 = arith.mulf %110, %111 : vector<8x288xf32>
    %c16 = arith.constant 16 : index
    %c19_112 = arith.constant 19 : index
    %113 = vector.load %arg12[%c16, %c19_112] : memref<32x326xf32, #tpu.memory_space<vmem>>, vector<8x288xf32>
    tpu.vector_store %arg12[%c16, %c19_112], %112 {strides = array<i32>} : memref<32x326xf32, #tpu.memory_space<vmem>>, vector<8x288xf32>,
    %cst_113 = arith.constant 0.000000e+00 : f32
    %114 = vector.broadcast %cst_113 : f32 to vector<8x288xf32>
    %c0_114 = arith.constant 0 : index
    %c0_115 = arith.constant 0 : index
    %115 = vector.load %arg12[%c0_114, %c0_115] : memref<32x326xf32, #tpu.memory_space<vmem>>, vector<24x288xf32>
    %c0_116 = arith.constant 0 : index
    %c0_117 = arith.constant 0 : index
    %c0_118 = arith.constant 0 : index
    %116 = vector.load %arg7[%c0_116, %c0_117, %c0_118] : memref<9x8x24xf32, #tpu.memory_space<vmem>>, vector<1x8x24xf32>
    %117 = vector.shape_cast %116 : vector<1x8x24xf32> to vector<8x24xf32>
    %cst_119 = arith.constant dense<0.000000e+00> : vector<8x288xf32>
    %118 = tpu.matmul %117, %115, %cst_119 {dimension_numbers = #tpu.dot_dimension_numbers<[1], [0], [0], [1], [0, 0, 1, 1], [], []>} : vector<8x24xf32>, vector<24x288xf32>, vector<8x288xf32> -> vector<8x288xf32>
    %119 = arith.addf %114, %118 : vector<8x288xf32>
    %c0_120 = arith.constant 0 : index
    %c1_121 = arith.constant 1 : index
    %120 = vector.load %arg12[%c0_120, %c1_121] : memref<32x326xf32, #tpu.memory_space<vmem>>, vector<24x288xf32>
    %c1_122 = arith.constant 1 : index
    %c0_123 = arith.constant 0 : index
    %c0_124 = arith.constant 0 : index
    %121 = vector.load %arg7[%c1_122, %c0_123, %c0_124] : memref<9x8x24xf32, #tpu.memory_space<vmem>>, vector<1x8x24xf32>
    %122 = vector.shape_cast %121 : vector<1x8x24xf32> to vector<8x24xf32>
    %cst_125 = arith.constant dense<0.000000e+00> : vector<8x288xf32>
    %123 = tpu.matmul %122, %120, %cst_125 {dimension_numbers = #tpu.dot_dimension_numbers<[1], [0], [0], [1], [0, 0, 1, 1], [], []>} : vector<8x24xf32>, vector<24x288xf32>, vector<8x288xf32> -> vector<8x288xf32>
    %124 = arith.addf %119, %123 : vector<8x288xf32>
    %c0_126 = arith.constant 0 : index
    %c2_127 = arith.constant 2 : index
    %125 = vector.load %arg12[%c0_126, %c2_127] : memref<32x326xf32, #tpu.memory_space<vmem>>, vector<24x288xf32>
    %c2_128 = arith.constant 2 : index
    %c0_129 = arith.constant 0 : index
    %c0_130 = arith.constant 0 : index
    %126 = vector.load %arg7[%c2_128, %c0_129, %c0_130] : memref<9x8x24xf32, #tpu.memory_space<vmem>>, vector<1x8x24xf32>
    %127 = vector.shape_cast %126 : vector<1x8x24xf32> to vector<8x24xf32>
    %cst_131 = arith.constant dense<0.000000e+00> : vector<8x288xf32>
    %128 = tpu.matmul %127, %125, %cst_131 {dimension_numbers = #tpu.dot_dimension_numbers<[1], [0], [0], [1], [0, 0, 1, 1], [], []>} : vector<8x24xf32>, vector<24x288xf32>, vector<8x288xf32> -> vector<8x288xf32>
    %129 = arith.addf %124, %128 : vector<8x288xf32>
    %c0_132 = arith.constant 0 : index
    %c18_133 = arith.constant 18 : index
    %130 = vector.load %arg12[%c0_132, %c18_133] : memref<32x326xf32, #tpu.memory_space<vmem>>, vector<24x288xf32>
    %c3_134 = arith.constant 3 : index
    %c0_135 = arith.constant 0 : index
    %c0_136 = arith.constant 0 : index
    %131 = vector.load %arg7[%c3_134, %c0_135, %c0_136] : memref<9x8x24xf32, #tpu.memory_space<vmem>>, vector<1x8x24xf32>
    %132 = vector.shape_cast %131 : vector<1x8x24xf32> to vector<8x24xf32>
    %cst_137 = arith.constant dense<0.000000e+00> : vector<8x288xf32>
    %133 = tpu.matmul %132, %130, %cst_137 {dimension_numbers = #tpu.dot_dimension_numbers<[1], [0], [0], [1], [0, 0, 1, 1], [], []>} : vector<8x24xf32>, vector<24x288xf32>, vector<8x288xf32> -> vector<8x288xf32>
    %134 = arith.addf %129, %133 : vector<8x288xf32>
    %c0_138 = arith.constant 0 : index
    %c19_139 = arith.constant 19 : index
    %135 = vector.load %arg12[%c0_138, %c19_139] : memref<32x326xf32, #tpu.memory_space<vmem>>, vector<24x288xf32>
    %c4_140 = arith.constant 4 : index
    %c0_141 = arith.constant 0 : index
    %c0_142 = arith.constant 0 : index
    %136 = vector.load %arg7[%c4_140, %c0_141, %c0_142] : memref<9x8x24xf32, #tpu.memory_space<vmem>>, vector<1x8x24xf32>
    %137 = vector.shape_cast %136 : vector<1x8x24xf32> to vector<8x24xf32>
    %cst_143 = arith.constant dense<0.000000e+00> : vector<8x288xf32>
    %138 = tpu.matmul %137, %135, %cst_143 {dimension_numbers = #tpu.dot_dimension_numbers<[1], [0], [0], [1], [0, 0, 1, 1], [], []>} : vector<8x24xf32>, vector<24x288xf32>, vector<8x288xf32> -> vector<8x288xf32>
    %139 = arith.addf %134, %138 : vector<8x288xf32>
    %c0_144 = arith.constant 0 : index
    %c20_145 = arith.constant 20 : index
    %140 = vector.load %arg12[%c0_144, %c20_145] : memref<32x326xf32, #tpu.memory_space<vmem>>, vector<24x288xf32>
    %c5_146 = arith.constant 5 : index
    %c0_147 = arith.constant 0 : index
    %c0_148 = arith.constant 0 : index
    %141 = vector.load %arg7[%c5_146, %c0_147, %c0_148] : memref<9x8x24xf32, #tpu.memory_space<vmem>>, vector<1x8x24xf32>
    %142 = vector.shape_cast %141 : vector<1x8x24xf32> to vector<8x24xf32>
    %cst_149 = arith.constant dense<0.000000e+00> : vector<8x288xf32>
    %143 = tpu.matmul %142, %140, %cst_149 {dimension_numbers = #tpu.dot_dimension_numbers<[1], [0], [0], [1], [0, 0, 1, 1], [], []>} : vector<8x24xf32>, vector<24x288xf32>, vector<8x288xf32> -> vector<8x288xf32>
    %144 = arith.addf %139, %143 : vector<8x288xf32>
    %c0_150 = arith.constant 0 : index
    %c36_151 = arith.constant 36 : index
    %145 = vector.load %arg12[%c0_150, %c36_151] : memref<32x326xf32, #tpu.memory_space<vmem>>, vector<24x288xf32>
    %c6_152 = arith.constant 6 : index
    %c0_153 = arith.constant 0 : index
    %c0_154 = arith.constant 0 : index
    %146 = vector.load %arg7[%c6_152, %c0_153, %c0_154] : memref<9x8x24xf32, #tpu.memory_space<vmem>>, vector<1x8x24xf32>
    %147 = vector.shape_cast %146 : vector<1x8x24xf32> to vector<8x24xf32>
    %cst_155 = arith.constant dense<0.000000e+00> : vector<8x288xf32>
    %148 = tpu.matmul %147, %145, %cst_155 {dimension_numbers = #tpu.dot_dimension_numbers<[1], [0], [0], [1], [0, 0, 1, 1], [], []>} : vector<8x24xf32>, vector<24x288xf32>, vector<8x288xf32> -> vector<8x288xf32>
    %149 = arith.addf %144, %148 : vector<8x288xf32>
    %c0_156 = arith.constant 0 : index
    %c37_157 = arith.constant 37 : index
    %150 = vector.load %arg12[%c0_156, %c37_157] : memref<32x326xf32, #tpu.memory_space<vmem>>, vector<24x288xf32>
    %c7_158 = arith.constant 7 : index
    %c0_159 = arith.constant 0 : index
    %c0_160 = arith.constant 0 : index
    %151 = vector.load %arg7[%c7_158, %c0_159, %c0_160] : memref<9x8x24xf32, #tpu.memory_space<vmem>>, vector<1x8x24xf32>
    %152 = vector.shape_cast %151 : vector<1x8x24xf32> to vector<8x24xf32>
    %cst_161 = arith.constant dense<0.000000e+00> : vector<8x288xf32>
    %153 = tpu.matmul %152, %150, %cst_161 {dimension_numbers = #tpu.dot_dimension_numbers<[1], [0], [0], [1], [0, 0, 1, 1], [], []>} : vector<8x24xf32>, vector<24x288xf32>, vector<8x288xf32> -> vector<8x288xf32>
    %154 = arith.addf %149, %153 : vector<8x288xf32>
    %c0_162 = arith.constant 0 : index
    %c38_163 = arith.constant 38 : index
    %155 = vector.load %arg12[%c0_162, %c38_163] : memref<32x326xf32, #tpu.memory_space<vmem>>, vector<24x288xf32>
    %c8_164 = arith.constant 8 : index
    %c0_165 = arith.constant 0 : index
    %c0_166 = arith.constant 0 : index
    %156 = vector.load %arg7[%c8_164, %c0_165, %c0_166] : memref<9x8x24xf32, #tpu.memory_space<vmem>>, vector<1x8x24xf32>
    %157 = vector.shape_cast %156 : vector<1x8x24xf32> to vector<8x24xf32>
    %cst_167 = arith.constant dense<0.000000e+00> : vector<8x288xf32>
    %158 = tpu.matmul %157, %155, %cst_167 {dimension_numbers = #tpu.dot_dimension_numbers<[1], [0], [0], [1], [0, 0, 1, 1], [], []>} : vector<8x24xf32>, vector<24x288xf32>, vector<8x288xf32> -> vector<8x288xf32>
    %159 = arith.addf %154, %158 : vector<8x288xf32>
    %c0_168 = arith.constant 0 : index
    %c0_169 = arith.constant 0 : index
    %160 = vector.load %arg8[%c0_168, %c0_169] : memref<8x1xf32, #tpu.memory_space<vmem>>, vector<8x1xf32>
    %161 = vector.broadcast %160 : vector<8x1xf32> to vector<8x288xf32>
    %162 = arith.addf %159, %161 : vector<8x288xf32>
    %cst_170 = arith.constant 0.000000e+00 : f32
    %163 = vector.broadcast %cst_170 : f32 to vector<8x288xf32>
    %164 = arith.maximumf %162, %163 : vector<8x288xf32>
    %165 = vector.broadcast %5 : vector<1x288xf32> to vector<8x288xf32>
    %166 = arith.mulf %164, %165 : vector<8x288xf32>
    %c24 = arith.constant 24 : index
    %c19_171 = arith.constant 19 : index
    %167 = vector.load %arg12[%c24, %c19_171] : memref<32x326xf32, #tpu.memory_space<vmem>>, vector<8x288xf32>
    tpu.vector_store %arg12[%c24, %c19_171], %166 {strides = array<i32>} : memref<32x326xf32, #tpu.memory_space<vmem>>, vector<8x288xf32>,
    %c0_172 = arith.constant 0 : index
    %c19_173 = arith.constant 19 : index
    %168 = vector.load %arg12[%c0_172, %c19_173] : memref<32x326xf32, #tpu.memory_space<vmem>>, vector<32x288xf32>
    %c0_174 = arith.constant 0 : index
    %c0_175 = arith.constant 0 : index
    %169 = vector.load %arg9[%c0_174, %c0_175] : memref<8x32xf32, #tpu.memory_space<vmem>>, vector<8x32xf32>
    %cst_176 = arith.constant dense<0.000000e+00> : vector<8x288xf32>
    %170 = tpu.matmul %169, %168, %cst_176 {dimension_numbers = #tpu.dot_dimension_numbers<[1], [0], [0], [1], [0, 0, 1, 1], [], []>} : vector<8x32xf32>, vector<32x288xf32>, vector<8x288xf32> -> vector<8x288xf32>
    %c0_177 = arith.constant 0 : index
    %c0_178 = arith.constant 0 : index
    %171 = vector.load %arg10[%c0_177, %c0_178] : memref<8x1xf32, #tpu.memory_space<vmem>>, vector<8x1xf32>
    %172 = vector.broadcast %171 : vector<8x1xf32> to vector<8x288xf32>
    %173 = arith.addf %170, %172 : vector<8x288xf32>
    %c0_179 = arith.constant 0 : index
    %c19_180 = arith.constant 19 : index
    %174 = vector.load %arg12[%c0_179, %c19_180] : memref<32x326xf32, #tpu.memory_space<vmem>>, vector<8x288xf32>
    %175 = arith.addf %173, %174 : vector<8x288xf32>
    %c0_181 = arith.constant 0 : index
    %c0_182 = arith.constant 0 : index
    %c0_183 = arith.constant 0 : index
    %176 = vector.load %arg11[%c0_181, %c0_182, %c0_183] : memref<1x8x288xf32, #tpu.memory_space<vmem>>, vector<1x8x288xf32>
    %177 = vector.shape_cast %176 : vector<1x8x288xf32> to vector<8x288xf32>
    %178 = vector.shape_cast %175 : vector<8x288xf32> to vector<1x8x288xf32>
    tpu.vector_store %arg11[%c0_181, %c0_182, %c0_183], %178 {strides = array<i32>} : memref<1x8x288xf32, #tpu.memory_space<vmem>>, vector<1x8x288xf32>,
    return
  }
  func.func @transform_0(%arg0: i32) -> (i32, i32, i32) {
    %c0_i32 = arith.constant 0 : i32
    %c0_i32_0 = arith.constant 0 : i32
    %c0_i32_1 = arith.constant 0 : i32
    return %arg0, %c0_i32, %c0_i32_0 : i32, i32, i32
  }
  func.func @transform_1(%arg0: i32) -> (i32, i32) {
    %c0_i32 = arith.constant 0 : i32
    %c0_i32_0 = arith.constant 0 : i32
    %c0_i32_1 = arith.constant 0 : i32
    return %c0_i32, %c0_i32_0 : i32, i32
  }
  func.func @transform_2(%arg0: i32) -> (i32, i32, i32) {
    %c0_i32 = arith.constant 0 : i32
    %c0_i32_0 = arith.constant 0 : i32
    %c0_i32_1 = arith.constant 0 : i32
    %c0_i32_2 = arith.constant 0 : i32
    return %c0_i32, %c0_i32_0, %c0_i32_1 : i32, i32, i32
  }
  func.func @transform_3(%arg0: i32) -> (i32, i32) {
    %c0_i32 = arith.constant 0 : i32
    %c0_i32_0 = arith.constant 0 : i32
    %c0_i32_1 = arith.constant 0 : i32
    return %c0_i32, %c0_i32_0 : i32, i32
  }
  func.func @transform_4(%arg0: i32) -> (i32, i32, i32) {
    %c0_i32 = arith.constant 0 : i32
    %c0_i32_0 = arith.constant 0 : i32
    %c0_i32_1 = arith.constant 0 : i32
    %c0_i32_2 = arith.constant 0 : i32
    return %c0_i32, %c0_i32_0, %c0_i32_1 : i32, i32, i32
  }
  func.func @transform_5(%arg0: i32) -> (i32, i32) {
    %c0_i32 = arith.constant 0 : i32
    %c0_i32_0 = arith.constant 0 : i32
    %c0_i32_1 = arith.constant 0 : i32
    return %c0_i32, %c0_i32_0 : i32, i32
  }
  func.func @transform_6(%arg0: i32) -> (i32, i32, i32) {
    %c0_i32 = arith.constant 0 : i32
    %c0_i32_0 = arith.constant 0 : i32
    %c0_i32_1 = arith.constant 0 : i32
    %c0_i32_2 = arith.constant 0 : i32
    return %c0_i32, %c0_i32_0, %c0_i32_1 : i32, i32, i32
  }
  func.func @transform_7(%arg0: i32) -> (i32, i32) {
    %c0_i32 = arith.constant 0 : i32
    %c0_i32_0 = arith.constant 0 : i32
    %c0_i32_1 = arith.constant 0 : i32
    return %c0_i32, %c0_i32_0 : i32, i32
  }
  func.func @transform_8(%arg0: i32) -> (i32, i32) {
    %c0_i32 = arith.constant 0 : i32
    %c0_i32_0 = arith.constant 0 : i32
    %c0_i32_1 = arith.constant 0 : i32
    return %c0_i32, %c0_i32_0 : i32, i32
  }
  func.func @transform_9(%arg0: i32) -> (i32, i32) {
    %c0_i32 = arith.constant 0 : i32
    %c0_i32_0 = arith.constant 0 : i32
    %c0_i32_1 = arith.constant 0 : i32
    return %c0_i32, %c0_i32_0 : i32, i32
  }
  func.func @transform_10(%arg0: i32) -> (i32, i32, i32) {
    %c0_i32 = arith.constant 0 : i32
    %c0_i32_0 = arith.constant 0 : i32
    %c0_i32_1 = arith.constant 0 : i32
    return %arg0, %c0_i32, %c0_i32_0 : i32, i32, i32
  }
}

</mosaic_0001>

<bundles_post_ra>
// kernel: tile.8
= control target key start
LH: loop header
LB: loop body
LE: loop exit
PB: predicated region body
PF: predicated region fallthrough
CT: control target
= control target key end

     0   :  { %s28_s0 = inlined_call_operand.vmem [shape: f32[18], index: 0, kind: input, shape index: {}]   ;;  %s29_s1 = inlined_call_operand.vmem [shape: f32[16,18], index: 1, kind: output, shape index: {}]  }
   0x1   :  { %v4_v0 = vld [vmem:[%s28_s0] ss:$0 sm:$0xff] }
   0x2   :  { %5 = vst [vmem:[%s29_s1] sm:$0xff] %v4_v0  ;;  %8 = vst [vmem:[%s29_s1 + $0x8] sm:$0xff] %v4_v0 }

// kernel: tile.9
= control target key start
LH: loop header
LB: loop body
LE: loop exit
PB: predicated region body
PF: predicated region fallthrough
CT: control target
= control target key end

     0   :  { %vm9_vm0 = vcmask 15360   ;;  %vm22_vm1 = vcmask 31744   ;;  %s169_s14 = smov 126   ;;  %s170_s15 = smov 108   ;;  %vm3_vm2 = vcmask 146432   ;;  %vm13_vm3 = vcmask 130048   ;;  %s257_s0 = inlined_call_operand.vmem [shape: f32[16,18], index: 0, kind: input, shape index: {}]   ;;  %s258_s1 = inlined_call_operand.vmem [shape: f32[1,288], index: 1, kind: output, shape index: {}]  }
   0x1   :  { %v135_v0 = vld [vmem:[%s257_s0 + $0x7] sm:$0x1]   ;;  %v139_v3 = vld [vmem:[%s257_s0 + $0x6] sm:$0x1]   ;;  %v137_v4 = vld [vmem:[%s257_s0 + $0xe] sm:$0x1]  }
   0x2   :  { %v136_v1 = vld [vmem:[%s257_s0 + $0x7] sm:$0x1]   ;;  %34 = vrot.lane.b32.xlu1 %v139_v3, %s170_s15  ;;  %v138_v5 = vld [vmem:[%s257_s0 + $0xe] sm:$0x1]   ;;  %v140_v7 = vld [vmem:[%s257_s0 + $0xd] sm:$0x1]  }
   0x3   :  { %v10_v2 = vsel %vm9_vm0, %v136_v1, %v135_v0  ;;  %v23_v6 = vsel %vm22_vm1, %v138_v5, %v137_v4  ;;  %s171_s20 = smov 124   ;;  %s172_s21 = smov 106   ;;  %v141_v8 = vld [vmem:[%s257_s0 + $0x5] sm:$0x1]   ;;  %v142_v9 = vld [vmem:[%s257_s0 + $0xc] sm:$0x1]  }
   0x4   :  { %11 = vrot.lane.b32.xlu0 %v10_v2, %s169_s14  ;;  %v2_v10 = vld [vmem:[%s257_s0] sm:$0x1]   ;;  %s173_s28 = smov 90   ;;  %s174_s29 = smov 88   ;;  %v143_v11 = vld [vmem:[%s257_s0 + $0x4] sm:$0x1]  }
   0x5   :  { %4 = vst.msk [vmem:[#allocation0] sm:$0x1] %vm3_vm2, %v2_v10   ;;  %v144_v12 = vld [vmem:[%s257_s0 + $0xb] sm:$0x1]   ;;  %s175_s5 = smov 72   ;;  %s176_s6 = smov 70  }
   0x6   :  { %40 = vrot.lane.b32.xlu1 %v140_v7, %s172_s21  ;;  %v145_v13 = vld [vmem:[%s257_s0 + $0x3] sm:$0x1]   ;;  %v146_v14 = vld [vmem:[%s257_s0 + $0xa] sm:$0x1]   ;;  %s177_s11 = smov 54   ;;  %s178_s12 = smov 52  }
   0x7   :  { %v147_v15 = vld [vmem:[%s257_s0 + $0x2] sm:$0x1]   ;;  %v148_v16 = vld [vmem:[%s257_s0 + $0x9] sm:$0x1]   ;;  %s179_s17 = smov 36   ;;  %s180_s18 = smov 34  }
   0x8   :  { %24 = vrot.lane.b32.xlu0 %v23_v6, %s171_s20  ;;  %v149_v17 = vld [vmem:[%s257_s0 + $0x1] sm:$0x1]   ;;  %v150_v18 = vld [vmem:[%s257_s0 + $0x8] sm:$0x1]   ;;  %s181_s23 = smov 18   ;;  %s182_s24 = smov 16  }
   0x9   :  { %v151_v19 = vld [vmem:[%s257_s0 + $0xf] sm:$0x1]   ;;  %s183_s0 = smov 14   ;;  %vm16_vm4 = vcmask 1048560   ;;  %vm36_vm5 = vcmask 1032032   ;;  %vm26_vm6 = vcmask 113664  }
   0xa   :  { %53 = vrot.lane.b32.xlu1 %v142_v9, %s174_s29  ;;  %vm29_vm7 = vcmask 1048544   ;;  %vm42_vm8 = vcmask 1015632   ;;  %vm49_vm9 = vcmask 884432   ;;  %vm55_vm10 = vcmask 868032  }
   0xb   :  { %vm62_vm11 = vcmask 736832   ;;  %vm68_vm12 = vcmask 720432   ;;  %vm75_vm13 = vcmask 589232   ;;  %vm81_vm14 = vcmask 572832  }
   0xc   :  { %47 = vrot.lane.b32.xlu0 %v141_v8, %s173_s28  ;;  %vm88_vm15 = vcmask 441632   ;;  %vm94_vm0 = vcmask 425232   ;;  %vm101_vm1 = vcmask 294032   ;;  %vm107_vm2 = vcmask 277632  }
   0xe   :  { %66 = vrot.lane.b32.xlu1 %v144_v12, %s176_s6 }
  0x10   :  { %60 = vrot.lane.b32.xlu0 %v143_v11, %s175_s5 }
  0x12   :  { %79 = vrot.lane.b32.xlu1 %v146_v14, %s178_s12 }
  0x14   :  { %73 = vrot.lane.b32.xlu0 %v145_v13, %s177_s11 }
  0x16   :  { %92 = vrot.lane.b32.xlu1 %v148_v16, %s180_s18 }
  0x18   :  { %86 = vrot.lane.b32.xlu0 %v147_v15, %s179_s17 }
  0x1a   :  { %105 = vrot.lane.b32.xlu1 %v150_v18, %s182_s24 }
  0x1c   :  { %99 = vrot.lane.b32.xlu0 %v149_v17, %s181_s23 }
  0x20   :  { %112 = vrot.lane.b32.xlu0 %v151_v19, %s183_s0 }
  0x74   :  { %v35_v21 = vpop.permute.xlu1 %34  }
  0x76   :  { %v12_v20 = vpop.permute.xlu0 %11  }
  0x77   :  { %15 = vst.msk [vmem:[#allocation0 + $0x8] sm:$0x1] %vm13_vm3, %v12_v20   ;;  %vm114_vm3 = vcmask 261232  }
  0x78   :  { %17 = vst.msk [vmem:[#allocation0] sm:$0x1] %vm16_vm4, %v12_v20   ;;  %v41_v23 = vpop.permute.xlu1 %40  }
  0x79   :  { %37 = vst.msk [vmem:[#allocation0] sm:$0x1] %vm36_vm5, %v35_v21  }
  0x7a   :  { %v25_v22 = vpop.permute.xlu0 %24  }
  0x7b   :  { %28 = vst.msk [vmem:[#allocation0 + $0x10] sm:$0x1] %vm26_vm6, %v25_v22  }
  0x7c   :  { %31 = vst.msk [vmem:[#allocation0 + $0x8] sm:$0x1] %vm29_vm7, %v25_v22   ;;  %v54_v25 = vpop.permute.xlu1 %53  }
  0x7d   :  { %44 = vst.msk [vmem:[#allocation0 + $0x8] sm:$0x1] %vm42_vm8, %v41_v23  }
  0x7e   :  { %v48_v24 = vpop.permute.xlu0 %47   ;;  %57 = vst.msk [vmem:[#allocation0 + $0x8] sm:$0x1] %vm55_vm10, %v54_v25  }
  0x7f   :  { %50 = vst.msk [vmem:[#allocation0] sm:$0x1] %vm49_vm9, %v48_v24  }
  0x80   :  { %v67_v27 = vpop.permute.xlu1 %66  }
  0x81   :  { %70 = vst.msk [vmem:[#allocation0 + $0x8] sm:$0x1] %vm68_vm12, %v67_v27  }
  0x82   :  { %v61_v26 = vpop.permute.xlu0 %60  }
  0x83   :  { %63 = vst.msk [vmem:[#allocation0] sm:$0x1] %vm62_vm11, %v61_v26  }
  0x84   :  { %v80_v29 = vpop.permute.xlu1 %79  }
  0x85   :  { %83 = vst.msk [vmem:[#allocation0 + $0x8] sm:$0x1] %vm81_vm14, %v80_v29  }
  0x86   :  { %v74_v28 = vpop.permute.xlu0 %73  }
  0x87   :  { %76 = vst.msk [vmem:[#allocation0] sm:$0x1] %vm75_vm13, %v74_v28  }
  0x88   :  { %v93_v31 = vpop.permute.xlu1 %92  }
  0x89   :  { %96 = vst.msk [vmem:[#allocation0 + $0x8] sm:$0x1] %vm94_vm0, %v93_v31  }
  0x8a   :  { %v87_v30 = vpop.permute.xlu0 %86  }
  0x8b   :  { %89 = vst.msk [vmem:[#allocation0] sm:$0x1] %vm88_vm15, %v87_v30  }
  0x8c   :  { %v106_v33 = vpop.permute.xlu1 %105  }
  0x8d   :  { %109 = vst.msk [vmem:[#allocation0 + $0x8] sm:$0x1] %vm107_vm2, %v106_v33  }
  0x8e   :  { %v100_v32 = vpop.permute.xlu0 %99  }
  0x8f   :  { %102 = vst.msk [vmem:[#allocation0] sm:$0x1] %vm101_vm1, %v100_v32  }
  0x92   :  { %v113_v34 = vpop.permute.xlu0 %112  }
  0x93   :  { %116 = vst.msk [vmem:[#allocation0 + $0x10] sm:$0x1] %vm114_vm3, %v113_v34  }
  0x94   :  { %v124_v36 = vld [vmem:[#allocation0 + $0x8] sm:$0x1] }
  0x95   :  { %152 = vst [vmem:[%s258_s1 + $0x1] sm:$0x1] %v124_v36 }
  0x96   :  { %v120_v35 = vld [vmem:[#allocation0] sm:$0x1] }
  0x97   :  { %122 = vst [vmem:[%s258_s1] sm:$0x1] %v120_v35 }
  0x9a   :  { %v129_v37 = vld [vmem:[#allocation0 + $0x10] sm:$0x1] }
  0x9b   :  { %153 = vst [vmem:[%s258_s1 + $0x2] sm:$0x1] %v129_v37 }

// kernel: residual_dense_block.1
= control target key start
LH: loop header
LB: loop body
LE: loop exit
PB: predicated region body
PF: predicated region fallthrough
CT: control target
= control target key end

     0   :  { %s6304_s13 = smov 0   ;;  %s7124_s0 = inlined_call_operand.vmem [shape: f32[2,8,326], index: 0, kind: input, shape index: {}]   ;;  %s7125_s1 = inlined_call_operand.vmem [shape: f32[1,288], index: 1, kind: input, shape index: {}]   ;;  %s7126_s2 = inlined_call_operand.vmem [shape: f32[9,8,8], index: 2, kind: input, shape index: {}]   ;;  %s7127_s3 = inlined_call_operand.vmem [shape: f32[8,1], index: 3, kind: input, shape index: {}]   ;;  %s7128_s4 = inlined_call_operand.vmem [shape: f32[9,8,16], index: 4, kind: input, shape index: {}]   ;;  %s7129_s5 = inlined_call_operand.vmem [shape: f32[8,1], index: 5, kind: input, shape index: {}]   ;;  %s7130_s6 = inlined_call_operand.vmem [shape: f32[9,8,24], index: 6, kind: input, shape index: {}]   ;;  %s7131_s7 = inlined_call_operand.vmem [shape: f32[8,1], index: 7, kind: input, shape index: {}]   ;;  %s7132_s8 = inlined_call_operand.vmem [shape: f32[8,32], index: 8, kind: input, shape index: {}]   ;;  %s7133_s9 = inlined_call_operand.vmem [shape: f32[8,1], index: 9, kind: input, shape index: {}]   ;;  %s7134_s10 = inlined_call_operand.vmem [shape: f32[2,8,288], index: 10, kind: output, shape index: {}]  }
   0x1 LB: > { %s5370_s14 = sadd.s32 4294967295, %s6234_s13   ;;  %p5374_p0 = scmp.ge.s32.totalorder %s6234_s13, 1  ;;  %s6234_s13 = sphi %s6304_s13, %s20_s13  }
   0x2   : > { %p312_p1 = scmp.lt.s32.totalorder %s6234_s13, 3 }
   0x4   : > { %p313_p2 = pnand %p5374_p0, %p312_p1 }
   0x5   : > { %p350_p3 = scmp.lt.s32.totalorder (!%p313_p2), %s5370_s14, 1  ;;  %vm362_vm0 = vcmask (!%p313_p2), 572416   ;;  %v6236_v0 = vmov (!%p313_p2), 0.0   ;;  %s6237_s19 = smov (!%p313_p2), 127   ;;  %vm6238_vm1 = vmmov (!%p313_p2), 0   ;;  %v1817_v5 = vld [vmem:[%s7127_s3] sm:$0xff] (!%p313_p2) }
   0x6   : > { %316 = sbr.rel (%p313_p2) target bundleno = 1974 (0x7b6), region = 60  ;;  %364 = vst [vmem:[#allocation2 + $0x18] sm:$0xff] (!%p313_p2), %v6236_v0  ;;  %367 = vst [vmem:[#allocation2 + $0x30] sm:$0xff] (!%p313_p2), %v6236_v0  ;;  %5545 = vmatprep.subr.mxu1 (!%p313_p2), %v6236_v0  ;;  %469 = vmatprep.mubr.f32.mxu0 (!%p313_p2), %v6236_v0  ;;  %s6239_s20 = smov (!%p313_p2), 126   ;;  %v6246_v6 = vmov (!%p313_p2), 0   ;;  %vm395_vm2 = vcmask (!%p313_p2), 1039360  }
   0x7   : > { %370 = vst [vmem:[#allocation2 + $0x48] sm:$0xff] (!%p313_p2), %v6236_v0  ;;  %363 = vst.msk [vmem:[#allocation2 + $0x10] sm:$0xff] (!%p313_p2), %vm362_vm0, %v6236_v0  ;;  %5547 = vmatprep.mubr.msk.f32.mxu1 (!%p313_p2), %vm6238_vm1, %v6236_v0  ;;  %s6240_s21 = smov (!%p313_p2), 110   ;;  %s6241_s22 = smov (!%p313_p2), 109   ;;  %5955 = vset.pattern.permute.xlu0 (!%p313_p2), %v6246_v6  ;;  %v5377_v13 = vld [vmem:[%s7126_s2 + $0x8] sm:$0xff] (!%p313_p2)  ;;  %vm401_vm3 = vcmask (!%p313_p2), 64512  }
   0x8   : > { %366 = vst.msk [vmem:[#allocation2 + $0x28] sm:$0xff] (!%p313_p2), %vm362_vm0, %v6236_v0  ;;  %369 = vst.msk [vmem:[#allocation2 + $0x40] sm:$0xff] (!%p313_p2), %vm362_vm0, %v6236_v0  ;;  %s6242_s23 = smov (!%p313_p2), 108   ;;  %s6243_s24 = smov (!%p313_p2), 92   ;;  %6076 = vset.pattern.permute.xlu1 (!%p313_p2), %v6246_v6  ;;  %vm698_vm4 = vcmask (!%p313_p2), 1031168   ;;  %v383_v18 = vld [vmem:[%s7126_s2] sm:$0xff] (!%p313_p2) }
   0x9   : > { %372 = vst.msk [vmem:[#allocation2 + $0x58] sm:$0xff] (!%p313_p2), %vm362_vm0, %v6236_v0  ;;  %s6244_s25 = smov (!%p313_p2), 91   ;;  %s6245_s26 = smov (!%p313_p2), 90   ;;  %vm859_vm5 = vcmask (!%p313_p2), 900096   ;;  %v5382_v23 = vld [vmem:[%s7126_s2 + $0x10] sm:$0xff] (!%p313_p2)  ;;  %v5385_v26 = vld [vmem:[%s7126_s2 + $0x18] sm:$0xff] (!%p313_p2) }
   0xa   : > { %vm1020_vm6 = vcmask (!%p313_p2), 891904   ;;  %v5388_v29 = vld [vmem:[%s7126_s2 + $0x20] sm:$0xff] (!%p313_p2)  ;;  %v5391_v34 = vld [vmem:[%s7126_s2 + $0x28] sm:$0xff] (!%p313_p2)  ;;  %vm1181_vm7 = vcmask (!%p313_p2), 883712   ;;  %v5394_v40 = vld [vmem:[%s7126_s2 + $0x30] sm:$0xff] (!%p313_p2)  ;;  %vm1342_vm8 = vcmask (!%p313_p2), 752640  }
   0xb   : > { %v5397_v43 = vld [vmem:[%s7126_s2 + $0x38] sm:$0xff] (!%p313_p2)  ;;  %v5400_v47 = vld [vmem:[%s7126_s2 + $0x40] sm:$0xff] (!%p313_p2)  ;;  %vm1503_vm9 = vcmask (!%p313_p2), 744448   ;;  %vm1664_vm10 = vcmask (!%p313_p2), 736256   ;;  %s6247_s11 = smov (!%p313_p2), 19   ;;  %vm1863_vm11 = vcmask (!%p313_p2), 1047704  }
   0xc   : > { %vm1857_vm12 = vcmask (!%p313_p2), 154624   ;;  %vm1866_vm13 = vcmask (!%p313_p2), 416768   ;;  %vm1905_vm14 = vcmask (!%p313_p2), 130048   ;;  %vm3477_vm15 = vcmask (!%p313_p2), 195584  }
   0xd   : > { %s7136_s14 = smov (!%p350_p3, %s5370_s14), 1 }
   0xe   : > { %s5933_s15 = smul.u32 24, %s7136_s14 }
  0x10   : > { %s354_s18 = scalar_lea.vmem %s7124_s0, %s5933_s15  ;;  %s359_s29 = scalar_lea.vmem %s7134_s10, %s5933_s15 }
  0x11   : > { %v6333_v1 = vld [vmem:[%s354_s18 + $0x8] sm:$0xff]  ;;  %v6335_v2 = vld [vmem:[%s354_s18] sm:$0xff]  ;;  %v375_v3 = vld [vmem:[%s354_s18 + $0x10] sm:$0xff] }
  0x12   : > { %377 = vst [vmem:[#allocation2 + $0x8] sm:$0xff] %v6333_v1  ;;  %391 = vrot.lane.b32.xlu0 %v6333_v1, %s6237_s19  ;;  %376 = vst [vmem:[#allocation2] sm:$0xff] %v6335_v2  ;;  %389 = vrot.lane.b32.xlu1 %v6335_v2, %s6237_s19 }
  0x13   : > { %378 = vst.msk [vmem:[#allocation2 + $0x10] sm:$0xff] %vm362_vm0, %v375_v3  ;;  %vm5147_vm0 = vcmask 261120  }
  0x16   : > { %694 = vrot.lane.b32.xlu1 %v6333_v1, %s6239_s20 }
  0x1a   : > { %v6348_v4 = vld [vmem:[#allocation2 + $0x10] sm:$0xff]  ;;  %692 = vrot.lane.b32.xlu1 %v6335_v2, %s6239_s20 }
  0x1b   : > { %393 = vrot.lane.b32.xlu0 %v6348_v4, %s6237_s19 }
  0x1e   : > { %857 = vrot.lane.b32.xlu1 %v6348_v4, %s6240_s21 }
  0x1f   : > { %696 = vrot.lane.b32.xlu0 %v6348_v4, %s6239_s20 }
  0x22   : > { %1016 = vrot.lane.b32.xlu1 %v6333_v1, %s6241_s22 }
  0x23   : > { %855 = vrot.lane.b32.xlu0 %v6333_v1, %s6240_s21 }
  0x26   : > { %1014 = vrot.lane.b32.xlu1 %v6335_v2, %s6241_s22 }
  0x27   : > { %853 = vrot.lane.b32.xlu0 %v6335_v2, %s6240_s21 }
  0x2a   : > { %1179 = vrot.lane.b32.xlu1 %v6348_v4, %s6242_s23 }
  0x2b   : > { %1018 = vrot.lane.b32.xlu0 %v6348_v4, %s6241_s22 }
  0x2e   : > { %1338 = vrot.lane.b32.xlu1 %v6333_v1, %s6243_s24 }
  0x2f   : > { %1177 = vrot.lane.b32.xlu0 %v6333_v1, %s6242_s23 }
  0x32   : > { %1336 = vrot.lane.b32.xlu1 %v6335_v2, %s6243_s24 }
  0x33   : > { %1175 = vrot.lane.b32.xlu0 %v6335_v2, %s6242_s23 }
  0x36   : > { %1501 = vrot.lane.b32.xlu1 %v6348_v4, %s6244_s25 }
  0x37   : > { %1340 = vrot.lane.b32.xlu0 %v6348_v4, %s6243_s24 }
  0x3a   : > { %1660 = vrot.lane.b32.xlu1 %v6333_v1, %s6245_s26 }
  0x3b   : > { %1499 = vrot.lane.b32.xlu0 %v6333_v1, %s6244_s25 }
  0x3e   : > { %1658 = vrot.lane.b32.xlu1 %v6335_v2, %s6245_s26 }
  0x3f   : > { %1497 = vrot.lane.b32.xlu0 %v6335_v2, %s6244_s25 }
  0x43   : > { %1662 = vrot.lane.b32.xlu0 %v6348_v4, %s6245_s26 }
  0x47   : > { %1820 = vperm.xlu0 %5955, %v1817_v5  }
  0x84   : > { %v390_v7 = vpop.permute.xlu1 %389  ;;  %v392_v8 = vpop.permute.xlu0 %391 }
  0x85   : > { %v396_v14 = vsel %vm395_vm2, %v390_v7, %v392_v8 }
  0x88   : > { %v695_v9 = vpop.permute.xlu1 %694 }
  0x8c   : > { %v693_v11 = vpop.permute.xlu1 %692 }
  0x8d   : > { %v394_v10 = vpop.permute.xlu0 %393  ;;  %v699_v21 = vsel %vm698_vm4, %v693_v11, %v695_v9 }
  0x8e   : > { %5546 = vmatpush3.msra.mxu1 %v394_v10  ;;  %v397_v12 = vsel %vm395_vm2, %v392_v8, %v394_v10 }
  0x8f   : > { %405 = vmatprep.subr.mxu0 %v397_v12  ;;  %5548 = vmatmul.mubr.msk.f32.vlgmr.msra.gmra.mrb[0].mxu1 %vm401_vm3, %v5377_v13 }
  0x90   : > { %406 = vmatpush1.msra.mxu0 %v396_v14  ;;  %5550 = vmatprep.subr.mxu1 %v6236_v0  ;;  %v858_v16 = vpop.permute.xlu1 %857 }
  0x91   : > { %5378 = vmatmul.mubr.msk.f32.vlgmr.msra.gmra.mrb[0].mxu0 %vm401_vm3, %v5377_v13  ;;  %549 = vmatprep.subr.mxu0 %v6333_v1  ;;  %v697_v15 = vpop.permute.xlu0 %696 }
  0x92   : > { %550 = vmatpush1.msra.mxu0 %v6335_v2  ;;  %613 = vmatprep.mubr.f32.mxu0 %v6236_v0  ;;  %v700_v17 = vsel %vm698_vm4, %v695_v9, %v697_v15 }
  0x93   : > { %5551 = vmatpush3.msra.mxu1 %v6348_v4  ;;  %707 = vmatprep.subr.mxu0 %v700_v17 }
  0x94   : > { %5552 = vmatprep.mubr.msk.f32.mxu1 %vm6238_vm1, %v6236_v0  ;;  %5555 = vmatprep.subr.mxu1 %v6236_v0  ;;  %v1017_v20 = vpop.permute.xlu1 %1016 }
  0x95   : > { %5553 = vmatmul.mubr.msk.f32.vlgmr.msra.gmra.mrb[2].mxu1 %vm401_vm3, %v383_v18  ;;  %v856_v19 = vpop.permute.xlu0 %855 }
  0x96   : > { %5556 = vmatpush3.msra.mxu1 %v697_v15  ;;  %5557 = vmatprep.mubr.msk.f32.mxu1 %vm6238_vm1, %v6236_v0  ;;  %v861_v22 = vsel %vm859_vm5, %v856_v19, %v858_v16 }
  0x97   : > { %5560 = vmatprep.subr.mxu1 %v6236_v0 }
  0x98   : > { %v1015_v25 = vpop.permute.xlu1 %1014 }
  0x99   : > { %5380 = vmatmul.mubr.msk.f32.vlgmr.msra.gmra.mrb[0].mxu0 %vm401_vm3, %v383_v18  ;;  %v854_v24 = vpop.permute.xlu0 %853  ;;  %5558 = vmatmul.mubr.msk.f32.vlgmr.msra.gmra.mrb[4].mxu1 %vm401_vm3, %v5382_v23  ;;  %v1021_v37 = vsel %vm1020_vm6, %v1015_v25, %v1017_v20 }
  0x9a   : > { %708 = vmatpush1.msra.mxu0 %v699_v21  ;;  %771 = vmatprep.mubr.f32.mxu0 %v6236_v0  ;;  %v860_v30 = vsel %vm859_vm5, %v854_v24, %v856_v19  ;;  %v379_v24 = vld [vmem:[%s7125_s1] sm:$0x7] }
  0x9b   : > { %868 = vmatprep.subr.mxu0 %v861_v22  ;;  %5561 = vmatpush3.msra.mxu1 %v858_v16  ;;  %v1830_v16 = vlaneseq }
  0x9c   : > { %5562 = vmatprep.mubr.msk.f32.mxu1 %vm6238_vm1, %v6236_v0  ;;  %5565 = vmatprep.subr.mxu1 %v6236_v0  ;;  %v1180_v28 = vpop.permute.xlu1 %1179 }
  0x9d   : > { %v1019_v27 = vpop.permute.xlu0 %1018  ;;  %5563 = vmatmul.mubr.msk.f32.vlgmr.msra.gmra.mrb[6].mxu1 %vm401_vm3, %v5385_v26 }
  0x9e   : > { %5566 = vmatpush3.msra.mxu1 %v1019_v27  ;;  %5567 = vmatprep.mubr.msk.f32.mxu1 %vm6238_vm1, %v6236_v0  ;;  %v1022_v31 = vsel %vm1020_vm6, %v1017_v20, %v1019_v27  ;;  %v1831_v20 = vshrl.u32 %v1830_v16, 7 }
  0x9f   : > { %5570 = vmatprep.subr.mxu1 %v6236_v0 }
  0xa0   : > { %v1339_v33 = vpop.permute.xlu1 %1338  ;;  %v1840_v21 = vsub.s32 2, %v1831_v20 }
  0xa1   : > { %5383 = vmatmul.mubr.msk.f32.vlgmr.msra.gmra.mrb[0].mxu0 %vm401_vm3, %v5382_v23  ;;  %v1178_v32 = vpop.permute.xlu0 %1177  ;;  %5568 = vmatmul.mubr.msk.f32.vlgmr.msra.gmra.mrb[8].mxu1 %vm401_vm3, %v5388_v29 }
  0xa2   : > { %869 = vmatpush1.msra.mxu0 %v860_v30  ;;  %932 = vmatprep.mubr.f32.mxu0 %v6236_v0  ;;  %v1183_v38 = vsel %vm1181_vm7, %v1178_v32, %v1180_v28 }
  0xa3   : > { %1029 = vmatprep.subr.mxu0 %v1022_v31  ;;  %5571 = vmatpush3.msra.mxu1 %v1180_v28  ;;  %v6497_v28 = vrot.slane %v379_v24, %v1840_v21  ;;  %v1832_v31 = vsub.s32 0, %v1831_v20 }
  0xa4   : > { %5572 = vmatprep.mubr.msk.f32.mxu1 %vm6238_vm1, %v6236_v0  ;;  %5575 = vmatprep.subr.mxu1 %v6236_v0  ;;  %v1337_v36 = vpop.permute.xlu1 %1336 }
  0xa5   : > { %v1176_v35 = vpop.permute.xlu0 %1175  ;;  %5573 = vmatmul.mubr.msk.f32.vlgmr.msra.gmra.mrb[10].mxu1 %vm401_vm3, %v5391_v34  ;;  %v1343_v49 = vsel %vm1342_vm8, %v1337_v36, %v1339_v33  ;;  %v1836_v36 = vsub.s32 1, %v1831_v20 }
  0xa6   : > { %5577 = vmatprep.mubr.msk.f32.mxu1 %vm6238_vm1, %v6236_v0  ;;  %v1182_v44 = vsel %vm1181_vm7, %v1176_v35, %v1178_v32 }
  0xa8   : > { %v1502_v41 = vpop.permute.xlu1 %1501 }
  0xa9   : > { %5386 = vmatmul.mubr.msk.f32.vlgmr.msra.gmra.mrb[0].mxu0 %vm401_vm3, %v5385_v26  ;;  %v1341_v39 = vpop.permute.xlu0 %1340 }
  0xaa   : > { %1030 = vmatpush1.msra.mxu0 %v1021_v37  ;;  %1093 = vmatprep.mubr.f32.mxu0 %v6236_v0  ;;  %v1344_v45 = vsel %vm1342_vm8, %v1339_v33, %v1341_v39 }
  0xab   : > { %1190 = vmatprep.subr.mxu0 %v1183_v38  ;;  %5576 = vmatpush3.msra.mxu1 %v1341_v39 }
  0xac   : > { %5578 = vmatmul.mubr.msk.f32.vlgmr.msra.gmra.mrb[12].mxu1 %vm401_vm3, %v5394_v40  ;;  %5580 = vmatprep.subr.mxu1 %v6236_v0  ;;  %v1661_v51 = vpop.permute.xlu1 %1660 }
  0xad   : > { %v1500_v42 = vpop.permute.xlu0 %1499  ;;  %5581 = vmatpush3.msra.mxu1 %v1502_v41  ;;  %5582 = vmatprep.mubr.msk.f32.mxu1 %vm6238_vm1, %v6236_v0 }
  0xae   : > { %5585 = vmatprep.subr.mxu1 %v6236_v0  ;;  %v1505_v50 = vsel %vm1503_vm9, %v1500_v42, %v1502_v41  ;;  %v6504_v41 = vrot.slane %v379_v24, %v1836_v36  ;;  %v5408_v36 = vld [vmem:[%s7128_s4 + $0x10] sm:$0xff] }
  0xb0   : > { %5583 = vmatmul.mubr.msk.f32.vlgmr.msra.gmra.mrb[14].mxu1 %vm401_vm3, %v5397_v43  ;;  %v1659_v54 = vpop.permute.xlu1 %1658 }
  0xb1   : > { %5389 = vmatmul.mubr.msk.f32.vlgmr.msra.gmra.mrb[0].mxu0 %vm401_vm3, %v5388_v29  ;;  %v1498_v46 = vpop.permute.xlu0 %1497  ;;  %5587 = vmatprep.mubr.msk.f32.mxu1 %vm6238_vm1, %v6236_v0  ;;  %v1665_v55 = vsel %vm1664_vm10, %v1659_v54, %v1661_v51  ;;  %v3391_v54 = vld [vmem:[%s7129_s5] sm:$0xff] }
  0xb2   : > { %1191 = vmatpush1.msra.mxu0 %v1182_v44  ;;  %1254 = vmatprep.mubr.f32.mxu0 %v6236_v0  ;;  %v1504_v52 = vsel %vm1503_vm9, %v1498_v46, %v1500_v42 }
  0xb3   : > { %1351 = vmatprep.subr.mxu0 %v1344_v45 }
  0xb5   : > { %v1663_v48 = vpop.permute.xlu0 %1662 }
  0xb6   : > { %5586 = vmatpush3.msra.mxu1 %v1663_v48  ;;  %v1666_v53 = vsel %vm1664_vm10, %v1661_v51, %v1663_v48 }
  0xb7   : > { %5588 = vmatmul.mubr.msk.f32.vlgmr.msra.gmra.mrb[16].mxu1 %vm401_vm3, %v5400_v47 }
  0xb8   : > { %5594 = vmatprep.mubr.msk.f32.mxu1 %vm6238_vm1, %v6236_v0 }
  0xb9   : > { %5392 = vmatmul.mubr.msk.f32.vlgmr.msra.gmra.mrb[0].mxu0 %vm401_vm3, %v5391_v34  ;;  %v6501_v34 = vrot.slane %v379_v24, %v1832_v31 }
  0xba   : > { %1352 = vmatpush1.msra.mxu0 %v1343_v49  ;;  %1415 = vmatprep.mubr.f32.mxu0 %v6236_v0  ;;  %v6248_v49 = vmov 0.0|0.0  }
  0xbb   : > { %1512 = vmatprep.subr.mxu0 %v1505_v50  ;;  %5749 = vmatprep.subr.bf16.mxu1 %v6248_v49 }
  0xc1   : > { %5395 = vmatmul.mubr.msk.f32.vlgmr.msra.gmra.mrb[0].mxu0 %vm401_vm3, %v5394_v40 }
  0xc2   : > { %1513 = vmatpush1.msra.mxu0 %v1504_v52  ;;  %1576 = vmatprep.mubr.f32.mxu0 %v6236_v0 }
  0xc3   : > { %1673 = vmatprep.subr.mxu0 %v1666_v53 }
  0xc6   : > { %v1821_v23 = vpop.permute.xlu0 %1820 }
  0xc9   : > { %5398 = vmatmul.mubr.msk.f32.vlgmr.msra.gmra.mrb[0].mxu0 %vm401_vm3, %v5397_v43  ;;  %v5956_v43 = vpack.i.bf16 %v6348_v4, %v6333_v1 }
  0xca   : > { %1674 = vmatpush1.msra.mxu0 %v1665_v55  ;;  %1737 = vmatprep.mubr.f32.mxu0 %v6236_v0 }
  0xd1   : > { %5401 = vmatmul.mubr.msk.f32.vlgmr.msra.gmra.mrb[0].mxu0 %vm401_vm3, %v5400_v47 }
  0xd2   : > { %1973 = vmatprep.mubr.f32.mxu0 %v6236_v0 }
 0x162   : > { %v542_v56 = vpop.f32.mrb[0].mxu1 }
 0x163   : > { %v5549_v57 = vpop.f32.mrb[1].mxu1 }
 0x168   : > { %v686_v58 = vpop.f32.mrb[2].mxu1 }
 0x169   : > { %v687_v59 = vadd.f32 %v686_v58, %v542_v56  ;;  %v5554_v60 = vpop.f32.mrb[3].mxu1 }
 0x16c   : > { %v844_v61 = vpop.f32.mrb[4].mxu1 }
 0x16d   : > { %v850_v62 = vadd.f32 %v844_v61, %v687_v59  ;;  %v5559_v63 = vpop.f32.mrb[5].mxu1 }
 0x170   : > { %v1005_v3 = vpop.f32.mrb[6].mxu1 }
 0x171   : > { %v1011_v5 = vadd.f32 %v1005_v3, %v850_v62  ;;  %v5564_v6 = vpop.f32.mrb[7].mxu1 }
 0x174   : > { %v1166_v7 = vpop.f32.mrb[8].mxu1 }
 0x175   : > { %v1172_v8 = vadd.f32 %v1166_v7, %v1011_v5  ;;  %v5569_v9 = vpop.f32.mrb[9].mxu1 }
 0x178   : > { %v1327_v10 = vpop.f32.mrb[10].mxu1 }
 0x179   : > { %v1333_v11 = vadd.f32 %v1327_v10, %v1172_v8  ;;  %v5574_v12 = vpop.f32.mrb[11].mxu1 }
 0x17f   : > { %v1488_v13 = vpop.f32.mrb[12].mxu1 }
 0x180   : > { %v1494_v14 = vadd.f32 %v1488_v13, %v1333_v11  ;;  %v5579_v15 = vpop.f32.mrb[13].mxu1 }
 0x183   : > { %v1649_v17 = vpop.f32.mrb[14].mxu1 }
 0x184   : > { %v1655_v18 = vadd.f32 %v1649_v17, %v1494_v14  ;;  %v5584_v19 = vpop.f32.mrb[15].mxu1 }
 0x18a   : > { %v1810_v22 = vpop.f32.mrb[16].mxu1 }
 0x18b   : > { %v1816_v25 = vadd.f32 %v1810_v22, %v1655_v18  ;;  %v5589_v26 = vpop.f32.mrb[17].mxu1  ;;  %v5403_v18 = vld [vmem:[%s7128_s4 + $0x8] sm:$0xff] }
 0x18d   : > { %v1825_v27 = vadd.f32 %v1821_v23, %v1816_v25 }
 0x18f   : > { %v1828_v29 = vmax.f32 %v1825_v27, 0.0 }
 0x191   : > { %v1847_v30 = vmul.f32 %v6497_v28, %v1828_v29 }
 0x193   : > { %1855 = vrot.lane.b32.xlu0 %v1847_v30, %s6247_s11 }
 0x1a4   : > { %v1739_v32 = vpop.f32.mrb[0].mxu0 }
 0x1a5   : > { %v1823_v33 = vadd.f32 %v1821_v23, %v1739_v32  ;;  %v1741_v35 = vpop.f32.mrb[1].mxu0 }
 0x1a6   : > { %v1824_v37 = vadd.f32 %v1821_v23, %v1741_v35 }
 0x1a7   : > { %v1826_v38 = vmax.f32 %v1823_v33, 0.0 }
 0x1a8   : > { %v1827_v40 = vmax.f32 %v1824_v37, 0.0 }
 0x1a9   : > { %v1845_v39 = vmul.f32 %v6501_v34, %v1826_v38 }
 0x1aa   : > { %v1846_v42 = vmul.f32 %v6504_v41, %v1827_v40 }
 0x1ab   : > { %1851 = vrot.lane.b32.xlu1 %v1845_v39, %s6247_s11 }
 0x1af   : > { %1853 = vrot.lane.b32.xlu1 %v1846_v42, %s6247_s11 }
 0x1b3   : > { %5957 = vrot.lane.b32.xlu1 %v5956_v43, %s6237_s19 }
 0x205   : > { %v1856_v45 = vpop.permute.xlu0 %1855 }
 0x21d   : > { %v1852_v44 = vpop.permute.xlu1 %1851 }
 0x21e   : > { %1864 = vst.msk [vmem:[#allocation2 + $0x18] sm:$0xff] %vm1863_vm11, %v1852_v44 }
 0x221   : > { %v1854_v46 = vpop.permute.xlu1 %1853 }
 0x222   : > { %v6514_v47 = vsel %vm1857_vm12, %v1852_v44, %v1854_v46  ;;  %v1859_v48 = vsel %vm1857_vm12, %v1854_v46, %v1856_v45 }
 0x223   : > { %1865 = vst [vmem:[#allocation2 + $0x20] sm:$0xff] %v6514_v47  ;;  %1867 = vst.msk [vmem:[#allocation2 + $0x28] sm:$0xff] %vm1866_vm13, %v1859_v48  ;;  %v5752_v19 = vpack.c.bf16 %v6514_v47, %v6333_v1 }
 0x225   : > { %v6520_v50 = vld [vmem:[#allocation2 + $0x18] sm:$0xff]  ;;  %v5958_v55 = vpop.permute.xlu1 %5957 }
 0x226   : > { %v5966_v51 = vpack.i.bf16 %v6520_v50, %v6335_v2  ;;  %v5960_v57 = vunpack.i.h.bf16 %v5958_v55  ;;  %v5959_v58 = vunpack.i.l.bf16 %v5958_v55  ;;  %v5754_v1 = vpack.c.bf16 %v6520_v50, %v6335_v2 }
 0x228   : > { %5967 = vrot.lane.b32.xlu1 %v5966_v51, %s6237_s19  ;;  %v1896_v5 = vsel %vm395_vm2, %v5959_v58, %v5960_v57 }
 0x22a   : > { %v6525_v52 = vld [vmem:[#allocation2 + $0x28] sm:$0xff] }
 0x22b   : > { %v6529_v53 = vpack.i.bf16 %v6525_v52, %v6514_v47  ;;  %v5757_v20 = vpack.c.bf16 %v6525_v52, %v6348_v4  ;;  %v1874_v4 = vld [vmem:[%s7128_s4] sm:$0xff] }
 0x22d   : > { %5977 = vrot.lane.b32.xlu1 %v6529_v53, %s6239_s20  ;;  %5962 = vrot.lane.b32.xlu0 %v6529_v53, %s6237_s19 }
 0x231   : > { %5987 = vrot.lane.b32.xlu1 %v5956_v43, %s6240_s21  ;;  %5972 = vrot.lane.b32.xlu0 %v5956_v43, %s6239_s20 }
 0x235   : > { %5997 = vrot.lane.b32.xlu1 %v5966_v51, %s6240_s21  ;;  %5982 = vrot.lane.b32.xlu0 %v5966_v51, %s6239_s20 }
 0x239   : > { %6007 = vrot.lane.b32.xlu1 %v6529_v53, %s6241_s22  ;;  %5992 = vrot.lane.b32.xlu0 %v6529_v53, %s6240_s21 }
 0x23d   : > { %6017 = vrot.lane.b32.xlu1 %v5956_v43, %s6242_s23  ;;  %6002 = vrot.lane.b32.xlu0 %v5956_v43, %s6241_s22 }
 0x241   : > { %6027 = vrot.lane.b32.xlu1 %v5966_v51, %s6242_s23  ;;  %6012 = vrot.lane.b32.xlu0 %v5966_v51, %s6241_s22 }
 0x245   : > { %6037 = vrot.lane.b32.xlu1 %v6529_v53, %s6243_s24  ;;  %6022 = vrot.lane.b32.xlu0 %v6529_v53, %s6242_s23 }
 0x249   : > { %6047 = vrot.lane.b32.xlu1 %v5956_v43, %s6244_s25  ;;  %6032 = vrot.lane.b32.xlu0 %v5956_v43, %s6243_s24 }
 0x24d   : > { %6057 = vrot.lane.b32.xlu1 %v5966_v51, %s6244_s25  ;;  %6042 = vrot.lane.b32.xlu0 %v5966_v51, %s6243_s24 }
 0x251   : > { %6067 = vrot.lane.b32.xlu1 %v6529_v53, %s6245_s26  ;;  %6052 = vrot.lane.b32.xlu0 %v6529_v53, %s6244_s25 }
 0x255   : > { %6062 = vrot.lane.b32.xlu0 %v5956_v43, %s6245_s26  ;;  %3394 = vperm.xlu1 %6076, %v3391_v54   ;;  %v5411_v54 = vld [vmem:[%s7128_s4 + $0x18] sm:$0xff] }
 0x259   : > { %6072 = vrot.lane.b32.xlu0 %v5966_v51, %s6245_s26 }
 0x29a   : > { %v5968_v56 = vpop.permute.xlu1 %5967 }
 0x29b   : > { %v5969_v59 = vunpack.i.l.bf16 %v5968_v56  ;;  %v5970_v62 = vunpack.i.h.bf16 %v5968_v56 }
 0x29d   : > { %v1895_v6 = vsel %vm395_vm2, %v5969_v59, %v5959_v58 }
 0x29f   : > { %v5963_v60 = vpop.permute.xlu0 %5962  ;;  %v5978_v61 = vpop.permute.xlu1 %5977 }
 0x2a0   : > { %v5965_v63 = vunpack.i.h.bf16 %v5963_v60  ;;  %v5964_v3 = vunpack.i.l.bf16 %v5963_v60  ;;  %v5980_v14 = vunpack.i.h.bf16 %v5978_v61  ;;  %v5979_v15 = vunpack.i.l.bf16 %v5978_v61 }
 0x2a2   : > { %v1897_v7 = vsel %vm395_vm2, %v5970_v62, %v5964_v3  ;;  %v5750_v8 = vpack.c.bf16 %v5965_v63, %v5960_v57  ;;  %v1898_v9 = vsel %vm395_vm2, %v5964_v3, %v5965_v63  ;;  %v2211_v25 = vsel %vm698_vm4, %v5979_v15, %v5980_v14  ;;  %v6631_v62 = vld [vmem:[%s7128_s4 + $0x20] sm:$0xff] }
 0x2a3   : > { %v5747_v10 = vpack.c.bf16 %v1897_v7, %v1895_v6  ;;  %v5973_v11 = vpop.permute.xlu0 %5972  ;;  %v6568_v12 = vpop.permute.xlu1 %5987  ;;  %v5745_v13 = vpack.c.bf16 %v1898_v9, %v1896_v5 }
 0x2a4   : > { %v5975_v16 = vunpack.i.h.bf16 %v5973_v11  ;;  %v5974_v17 = vunpack.i.l.bf16 %v5973_v11  ;;  %5751 = vmatpush3.bf16.msra.mxu1 %v5750_v8  ;;  %v5990_v24 = vunpack.i.h.bf16 %v6568_v12  ;;  %v5989_v31 = vunpack.i.l.bf16 %v6568_v12 }
 0x2a5   : > { %5746 = vmatprep.subr.bf16.mxu0 %v5745_v13  ;;  %5756 = vmatprep.subr.bf16.mxu1 %v6248_v49 }
 0x2a6   : > { %5748 = vmatpush1.bf16.msra.mxu0 %v5747_v10  ;;  %v2209_v21 = vsel %vm698_vm4, %v5974_v17, %v5975_v16  ;;  %v5764_v30 = vpack.c.bf16 %v5980_v14, %v5975_v16  ;;  %v2380_v37 = vsel %vm859_vm5, %v5989_v31, %v5990_v24 }
 0x2a7   : > { %v5983_v22 = vpop.permute.xlu0 %5982  ;;  %v6579_v23 = vpop.permute.xlu1 %5997  ;;  %5753 = vmatprep.subr.bf16.mxu0 %v5752_v19  ;;  %5595 = vmatmul.mubr.msk.f32.vlgmr.msra.gmra.mrb[18].mxu1 %vm1905_vm14, %v5403_v18  ;;  %v5759_v29 = vpack.c.bf16 %v2211_v25, %v2209_v21 }
 0x2a8   : > { %5758 = vmatpush3.bf16.msra.mxu1 %v5757_v20  ;;  %5601 = vmatprep.mubr.msk.f32.mxu1 %vm6238_vm1, %v6236_v0  ;;  %v5985_v26 = vunpack.i.h.bf16 %v5983_v22  ;;  %v5984_v27 = vunpack.i.l.bf16 %v5983_v22  ;;  %v6000_v57 = vunpack.i.h.bf16 %v6579_v23  ;;  %v5999_v58 = vunpack.i.l.bf16 %v6579_v23  ;;  %v6657_v22 = vld [vmem:[%s7128_s4 + $0x28] sm:$0xff] }
 0x2a9   : > { %5404 = vmatmul.mubr.msk.f32.vlgmr.msra.gmra.mrb[2].mxu0 %vm1905_vm14, %v5403_v18  ;;  %5763 = vmatprep.subr.bf16.mxu1 %v6248_v49 }
 0x2aa   : > { %5755 = vmatpush1.bf16.msra.mxu0 %v5754_v1  ;;  %2117 = vmatprep.mubr.f32.mxu0 %v6236_v0  ;;  %v2208_v38 = vsel %vm698_vm4, %v5984_v27, %v5974_v17  ;;  %v2210_v39 = vsel %vm698_vm4, %v5985_v26, %v5979_v15  ;;  %v2379_v6 = vsel %vm859_vm5, %v5999_v58, %v5989_v31 }
 0x2ab   : > { %v5993_v2 = vpop.permute.xlu0 %5992  ;;  %v6595_v32 = vpop.permute.xlu1 %6007  ;;  %5760 = vmatprep.subr.bf16.mxu0 %v5759_v29  ;;  %5602 = vmatmul.mubr.msk.f32.vlgmr.msra.gmra.mrb[20].mxu1 %vm1905_vm14, %v1874_v4  ;;  %v5761_v46 = vpack.c.bf16 %v2210_v39, %v2208_v38 }
 0x2ac   : > { %v5995_v33 = vunpack.i.h.bf16 %v5993_v2  ;;  %v5994_v35 = vunpack.i.l.bf16 %v5993_v2  ;;  %5765 = vmatpush3.bf16.msra.mxu1 %v5764_v30  ;;  %5608 = vmatprep.mubr.msk.f32.mxu1 %vm6238_vm1, %v6236_v0  ;;  %v6010_v48 = vunpack.i.h.bf16 %v6595_v32  ;;  %v6009_v61 = vunpack.i.l.bf16 %v6595_v32  ;;  %v6673_v30 = vld [vmem:[%s7128_s4 + $0x30] sm:$0xff] }
 0x2ad   : > { %5770 = vmatprep.subr.bf16.mxu1 %v6248_v49 }
 0x2ae   : > { %v5771_v40 = vpack.c.bf16 %v5995_v33, %v5990_v24  ;;  %v2382_v42 = vsel %vm859_vm5, %v5994_v35, %v5995_v33  ;;  %v2381_v63 = vsel %vm859_vm5, %v6000_v57, %v5994_v35  ;;  %v2553_v11 = vsel %vm1020_vm6, %v6009_v61, %v6010_v48 }
 0x2af   : > { %v6003_v43 = vpop.permute.xlu0 %6002  ;;  %v6608_v44 = vpop.permute.xlu1 %6017  ;;  %5609 = vmatmul.mubr.msk.f32.vlgmr.msra.gmra.mrb[22].mxu1 %vm1905_vm14, %v5408_v36  ;;  %v5766_v45 = vpack.c.bf16 %v2382_v42, %v2380_v37  ;;  %v5768_v9 = vpack.c.bf16 %v2381_v63, %v2379_v6 }
 0x2b0   : > { %v6005_v51 = vunpack.i.h.bf16 %v6003_v43  ;;  %5772 = vmatpush3.bf16.msra.mxu1 %v5771_v40  ;;  %5615 = vmatprep.mubr.msk.f32.mxu1 %vm6238_vm1, %v6236_v0  ;;  %v6004_v55 = vunpack.i.l.bf16 %v6003_v43  ;;  %v6020_v3 = vunpack.i.h.bf16 %v6608_v44  ;;  %v6019_v19 = vunpack.i.l.bf16 %v6608_v44 }
 0x2b1   : > { %5406 = vmatmul.mubr.msk.f32.vlgmr.msra.gmra.mrb[2].mxu0 %vm1905_vm14, %v1874_v4  ;;  %5777 = vmatprep.subr.bf16.mxu1 %v6248_v49 }
 0x2b2   : > { %v5778_v56 = vpack.c.bf16 %v6010_v48, %v6005_v51  ;;  %5762 = vmatpush1.bf16.msra.mxu0 %v5761_v46  ;;  %2285 = vmatprep.mubr.f32.mxu0 %v6236_v0  ;;  %v2551_v5 = vsel %vm1020_vm6, %v6004_v55, %v6005_v51  ;;  %v2722_v25 = vsel %vm1181_vm7, %v6019_v19, %v6020_v3 }
 0x2b3   : > { %5767 = vmatprep.subr.bf16.mxu0 %v5766_v45  ;;  %v6013_v59 = vpop.permute.xlu0 %6012  ;;  %v6622_v60 = vpop.permute.xlu1 %6027  ;;  %5616 = vmatmul.mubr.msk.f32.vlgmr.msra.gmra.mrb[24].mxu1 %vm1905_vm14, %v5411_v54  ;;  %v5773_v14 = vpack.c.bf16 %v2553_v11, %v2551_v5 }
 0x2b4   : > { %5779 = vmatpush3.bf16.msra.mxu1 %v5778_v56  ;;  %5622 = vmatprep.mubr.msk.f32.mxu1 %vm6238_vm1, %v6236_v0  ;;  %v6015_v12 = vunpack.i.h.bf16 %v6013_v59  ;;  %v6014_v13 = vunpack.i.l.bf16 %v6013_v59  ;;  %v6030_v33 = vunpack.i.h.bf16 %v6622_v60  ;;  %v6029_v35 = vunpack.i.l.bf16 %v6622_v60 }
 0x2b5   : > { %5784 = vmatprep.subr.bf16.mxu1 %v6248_v49 }
 0x2b6   : > { %v2550_v23 = vsel %vm1020_vm6, %v6014_v13, %v6004_v55  ;;  %v2552_v24 = vsel %vm1020_vm6, %v6015_v12, %v6009_v61  ;;  %v2721_v44 = vsel %vm1181_vm7, %v6029_v35, %v6019_v19  ;;  %v5423_v55 = vld [vmem:[%s7128_s4 + $0x38] sm:$0xff] }
 0x2b7   : > { %v6023_v7 = vpop.permute.xlu0 %6022  ;;  %v6638_v8 = vpop.permute.xlu1 %6037  ;;  %5623 = vmatmul.mubr.msk.f32.vlgmr.msra.gmra.mrb[26].mxu1 %vm1905_vm14, %v6631_v62  ;;  %v5775_v29 = vpack.c.bf16 %v2552_v24, %v2550_v23 }
 0x2b8   : > { %v6025_v10 = vunpack.i.h.bf16 %v6023_v7  ;;  %5629 = vmatprep.mubr.msk.f32.mxu1 %vm6238_vm1, %v6236_v0  ;;  %v6024_v15 = vunpack.i.l.bf16 %v6023_v7  ;;  %v6040_v20 = vunpack.i.h.bf16 %v6638_v8  ;;  %v6039_v37 = vunpack.i.l.bf16 %v6638_v8 }
 0x2b9   : > { %5409 = vmatmul.mubr.msk.f32.vlgmr.msra.gmra.mrb[2].mxu0 %vm1905_vm14, %v5408_v36 }
 0x2ba   : > { %v5785_v16 = vpack.c.bf16 %v6025_v10, %v6020_v3  ;;  %5769 = vmatpush1.bf16.msra.mxu0 %v5768_v9  ;;  %2456 = vmatprep.mubr.f32.mxu0 %v6236_v0  ;;  %v2724_v4 = vsel %vm1181_vm7, %v6024_v15, %v6025_v10  ;;  %v2723_v39 = vsel %vm1181_vm7, %v6030_v33, %v6024_v15 }
 0x2bb   : > { %5774 = vmatprep.subr.bf16.mxu0 %v5773_v14  ;;  %v6647_v17 = vpop.permute.xlu0 %6032  ;;  %v6649_v18 = vpop.permute.xlu1 %6047  ;;  %v5780_v31 = vpack.c.bf16 %v2724_v4, %v2722_v25  ;;  %v5782_v46 = vpack.c.bf16 %v2723_v39, %v2721_v44 }
 0x2bc   : > { %v6035_v21 = vunpack.i.h.bf16 %v6647_v17  ;;  %5786 = vmatpush3.bf16.msra.mxu1 %v5785_v16  ;;  %v6034_v2 = vunpack.i.l.bf16 %v6647_v17  ;;  %v6050_v32 = vunpack.i.h.bf16 %v6649_v18  ;;  %v6049_v61 = vunpack.i.l.bf16 %v6649_v18 }
 0x2bd   : > { %5791 = vmatprep.subr.bf16.mxu1 %v6248_v49 }
 0x2be   : > { %v5792_v1 = vpack.c.bf16 %v6040_v20, %v6035_v21  ;;  %v2893_v43 = vsel %vm1342_vm8, %v6034_v2, %v6035_v21  ;;  %v3064_v5 = vsel %vm1503_vm9, %v6049_v61, %v6050_v32 }
 0x2bf   : > { %v6043_v26 = vpop.permute.xlu0 %6042  ;;  %v6664_v27 = vpop.permute.xlu1 %6057  ;;  %5630 = vmatmul.mubr.msk.f32.vlgmr.msra.gmra.mrb[28].mxu1 %vm1905_vm14, %v6657_v22 }
 0x2c0   : > { %5793 = vmatpush3.bf16.msra.mxu1 %v5792_v1  ;;  %5636 = vmatprep.mubr.msk.f32.mxu1 %vm6238_vm1, %v6236_v0  ;;  %v6045_v56 = vunpack.i.h.bf16 %v6043_v26  ;;  %v6044_v57 = vunpack.i.l.bf16 %v6043_v26  ;;  %v6060_v10 = vunpack.i.h.bf16 %v6664_v27  ;;  %v6059_v11 = vunpack.i.l.bf16 %v6664_v27 }
 0x2c1   : > { %5412 = vmatmul.mubr.msk.f32.vlgmr.msra.gmra.mrb[2].mxu0 %vm1905_vm14, %v5411_v54  ;;  %5798 = vmatprep.subr.bf16.mxu1 %v6248_v49  ;;  %v2895_v54 = vsel %vm1342_vm8, %v6039_v37, %v6040_v20 }
 0x2c2   : > { %5776 = vmatpush1.bf16.msra.mxu0 %v5775_v29  ;;  %2627 = vmatprep.mubr.f32.mxu0 %v6236_v0  ;;  %v5787_v58 = vpack.c.bf16 %v2895_v54, %v2893_v43  ;;  %v2892_v63 = vsel %vm1342_vm8, %v6044_v57, %v6034_v2  ;;  %v2894_v3 = vsel %vm1342_vm8, %v6045_v56, %v6039_v37 }
 0x2c3   : > { %5781 = vmatprep.subr.bf16.mxu0 %v5780_v31  ;;  %v6053_v36 = vpop.permute.xlu0 %6052  ;;  %5637 = vmatmul.mubr.msk.f32.vlgmr.msra.gmra.mrb[30].mxu1 %vm1905_vm14, %v6673_v30  ;;  %v6068_v40 = vpop.permute.xlu1 %6067  ;;  %v5789_v7 = vpack.c.bf16 %v2894_v3, %v2892_v63  ;;  %v3063_v16 = vsel %vm1503_vm9, %v6059_v11, %v6049_v61 }
 0x2c4   : > { %v6055_v38 = vunpack.i.h.bf16 %v6053_v36  ;;  %5643 = vmatprep.mubr.msk.f32.mxu1 %vm6238_vm1, %v6236_v0  ;;  %v6070_v48 = vunpack.i.h.bf16 %v6068_v40  ;;  %v6054_v59 = vunpack.i.l.bf16 %v6053_v36  ;;  %v6069_v12 = vunpack.i.l.bf16 %v6068_v40 }
 0x2c6   : > { %v5799_v42 = vpack.c.bf16 %v6055_v38, %v6050_v32  ;;  %v3066_v6 = vsel %vm1503_vm9, %v6054_v59, %v6055_v38  ;;  %v3065_v13 = vsel %vm1503_vm9, %v6060_v10, %v6054_v59  ;;  %v3237_v18 = vsel %vm1664_vm10, %v6069_v12, %v6070_v48  ;;  %v6745_v10 = vld [vmem:[#allocation2] sm:$0xff] }
 0x2c7   : > { %v6063_v45 = vpop.permute.xlu0 %6062  ;;  %v5794_v8 = vpack.c.bf16 %v3066_v6, %v3064_v5  ;;  %v5796_v17 = vpack.c.bf16 %v3065_v13, %v3063_v16  ;;  %v6734_v6 = vld [vmem:[#allocation2 + $0x8] sm:$0xff]  ;;  %v6751_v11 = vpack.i.bf16 %v6520_v50, %v6745_v10 }
 0x2c8   : > { %v6065_v51 = vunpack.i.h.bf16 %v6063_v45  ;;  %5800 = vmatpush3.bf16.msra.mxu1 %v5799_v42  ;;  %v6064_v9 = vunpack.i.l.bf16 %v6063_v45 }
 0x2c9   : > { %5415 = vmatmul.mubr.msk.f32.vlgmr.msra.gmra.mrb[2].mxu0 %vm1905_vm14, %v6631_v62  ;;  %5805 = vmatprep.subr.bf16.mxu1 %v6248_v49  ;;  %v5426_v62 = vld [vmem:[%s7128_s4 + $0x40] sm:$0xff] }
 0x2ca   : > { %v5806_v60 = vpack.c.bf16 %v6070_v48, %v6065_v51  ;;  %5783 = vmatpush1.bf16.msra.mxu0 %v5782_v46  ;;  %2798 = vmatprep.mubr.f32.mxu0 %v6236_v0  ;;  %v3235_v15 = vsel %vm1664_vm10, %v6064_v9, %v6065_v51 }
 0x2cb   : > { %5788 = vmatprep.subr.bf16.mxu0 %v5787_v58  ;;  %5644 = vmatmul.mubr.msk.f32.vlgmr.msra.gmra.mrb[32].mxu1 %vm1905_vm14, %v5423_v55  ;;  %v6073_v14 = vpop.permute.xlu0 %6072  ;;  %v5801_v21 = vpack.c.bf16 %v3237_v18, %v3235_v15 }
 0x2cc   : > { %5807 = vmatpush3.bf16.msra.mxu1 %v5806_v60  ;;  %5650 = vmatprep.mubr.msk.f32.mxu1 %vm6238_vm1, %v6236_v0  ;;  %v6075_v19 = vunpack.i.h.bf16 %v6073_v14  ;;  %v6074_v20 = vunpack.i.l.bf16 %v6073_v14 }
 0x2cd   : > { %5812 = vmatprep.subr.bf16.mxu1 %v6248_v49 }
 0x2ce   : > { %v3236_v23 = vsel %vm1664_vm10, %v6075_v19, %v6069_v12 }
 0x2cf   : > { %5651 = vmatmul.mubr.msk.f32.vlgmr.msra.gmra.mrb[34].mxu1 %vm1905_vm14, %v5426_v62 }
 0x2d0   : > { %5659 = vmatprep.mubr.msk.f32.mxu1 %vm6238_vm1, %v6236_v0 }
 0x2d1   : > { %5418 = vmatmul.mubr.msk.f32.vlgmr.msra.gmra.mrb[2].mxu0 %vm1905_vm14, %v6657_v22  ;;  %v3234_v22 = vsel %vm1664_vm10, %v6074_v20, %v6064_v9 }
 0x2d2   : > { %5790 = vmatpush1.bf16.msra.mxu0 %v5789_v7  ;;  %2969 = vmatprep.mubr.f32.mxu0 %v6236_v0  ;;  %v5803_v24 = vpack.c.bf16 %v3236_v23, %v3234_v22  ;;  %v6736_v7 = vld [vmem:[#allocation2 + $0x10] sm:$0xff] }
 0x2d3   : > { %5795 = vmatprep.subr.bf16.mxu0 %v5794_v8  ;;  %v6741_v8 = vpack.i.bf16 %v6736_v7, %v6734_v6 }
 0x2d9   : > { %5421 = vmatmul.mubr.msk.f32.vlgmr.msra.gmra.mrb[2].mxu0 %vm1905_vm14, %v6673_v30 }
 0x2da   : > { %5797 = vmatpush1.bf16.msra.mxu0 %v5796_v17  ;;  %3140 = vmatprep.mubr.f32.mxu0 %v6236_v0 }
 0x2db   : > { %5802 = vmatprep.subr.bf16.mxu0 %v5801_v21 }
 0x2e1   : > { %5424 = vmatmul.mubr.msk.f32.vlgmr.msra.gmra.mrb[2].mxu0 %vm1905_vm14, %v5423_v55  ;;  %v3395_v55 = vpop.permute.xlu1 %3394 }
 0x2e2   : > { %5804 = vmatpush1.bf16.msra.mxu0 %v5803_v24  ;;  %3311 = vmatprep.mubr.f32.mxu0 %v6236_v0 }
 0x2e9   : > { %5427 = vmatmul.mubr.msk.f32.vlgmr.msra.gmra.mrb[2].mxu0 %vm1905_vm14, %v5426_v62 }
 0x2ea   : > { %3545 = vmatprep.mubr.f32.mxu0 %v6236_v0 }
 0x37a   : > { %v2046_v1 = vpop.f32.mrb[18].mxu1 }
 0x37b   : > { %v5596_v25 = vpop.f32.mrb[19].mxu1 }
 0x37e   : > { %v2190_v4 = vpop.f32.mrb[20].mxu1 }
 0x37f   : > { %v2191_v26 = vadd.f32 %v2190_v4, %v2046_v1  ;;  %v5603_v27 = vpop.f32.mrb[21].mxu1 }
 0x382   : > { %v2358_v29 = vpop.f32.mrb[22].mxu1 }
 0x383   : > { %v2364_v30 = vadd.f32 %v2358_v29, %v2191_v26  ;;  %v5610_v31 = vpop.f32.mrb[23].mxu1 }
 0x386   : > { %v2529_v2 = vpop.f32.mrb[24].mxu1 }
 0x387   : > { %v2535_v32 = vadd.f32 %v2529_v2, %v2364_v30  ;;  %v5617_v33 = vpop.f32.mrb[25].mxu1 }
 0x388   : > { %v6791_v33 = vld [vmem:[#allocation2 + $0x48] sm:$0xff] }
 0x38a   : > { %v2700_v35 = vpop.f32.mrb[26].mxu1 }
 0x38b   : > { %v2706_v36 = vadd.f32 %v2700_v35, %v2535_v32  ;;  %v5624_v37 = vpop.f32.mrb[27].mxu1  ;;  %v5040_v35 = vld [vmem:[%s7131_s7] sm:$0xff] }
 0x392   : > { %v2871_v38 = vpop.f32.mrb[28].mxu1 }
 0x393   : > { %v2877_v39 = vadd.f32 %v2871_v38, %v2706_v36  ;;  %v5631_v40 = vpop.f32.mrb[29].mxu1 }
 0x396   : > { %v3042_v42 = vpop.f32.mrb[30].mxu1 }
 0x397   : > { %v3048_v43 = vadd.f32 %v3042_v42, %v2877_v39  ;;  %v5638_v0 = vpop.f32.mrb[31].mxu1 }
 0x39e   : > { %v3213_v44 = vpop.f32.mrb[32].mxu1 }
 0x39f   : > { %v3219_v45 = vadd.f32 %v3213_v44, %v3048_v43  ;;  %v5645_v46 = vpop.f32.mrb[33].mxu1  ;;  %v5429_v44 = vld [vmem:[%s7130_s6 + $0x8] sm:$0xff] }
 0x3a0   : > { %v5820_v46 = vpack.c.bf16 %v6525_v52, %v6736_v7  ;;  %v3432_v52 = vld [vmem:[%s7130_s6] sm:$0xff] }
 0x3a2   : > { %v3384_v48 = vpop.f32.mrb[34].mxu1 }
 0x3a3   : > { %v3390_v51 = vadd.f32 %v3384_v48, %v3219_v45  ;;  %v5652_v54 = vpop.f32.mrb[35].mxu1 }
 0x3a5   : > { %v3399_v57 = vadd.f32 %v3395_v55, %v3390_v51 }
 0x3a7   : > { %v3402_v63 = vmax.f32 %v3399_v57, 0.0 }
 0x3a9   : > { %v3405_v9 = vmul.f32 %v3402_v63, %v6497_v28  ;;  %v5815_v63 = vpack.c.bf16 %v6514_v47, %v6734_v6 }
 0x3bc   : > { %v3313_v56 = vpop.f32.mrb[2].mxu0 }
 0x3bd   : > { %v3397_v58 = vadd.f32 %v3395_v55, %v3313_v56  ;;  %v3315_v59 = vpop.f32.mrb[3].mxu0 }
 0x3be   : > { %v3398_v60 = vadd.f32 %v3395_v55, %v3315_v59 }
 0x3bf   : > { %v3400_v61 = vmax.f32 %v3397_v58, 0.0 }
 0x3c0   : > { %v3401_v62 = vmax.f32 %v3398_v60, 0.0 }
 0x3c1   : > { %v3403_v3 = vmul.f32 %v3400_v61, %v6501_v34 }
 0x3c2   : > { %v3404_v5 = vmul.f32 %v3401_v62, %v6504_v41 }
 0x3c3   : > { %3409 = vrot.lane.b32.xlu0 %v3403_v3, %s6247_s11  ;;  %v5817_v3 = vpack.c.bf16 %v6520_v50, %v6745_v10 }
 0x3c4   : > { %3411 = vrot.lane.b32.xlu1 %v3404_v5, %s6247_s11 }
 0x3c7   : > { %3413 = vrot.lane.b32.xlu0 %v3405_v9, %s6247_s11 }
 0x3c8   : > { %6078 = vrot.lane.b32.xlu1 %v6741_v8, %s6237_s19 }
 0x3cb   : > { %6083 = vrot.lane.b32.xlu0 %v6529_v53, %s6237_s19 }
 0x3cc   : > { %6088 = vrot.lane.b32.xlu1 %v6751_v11, %s6237_s19 }
 0x3cf   : > { %6098 = vrot.lane.b32.xlu0 %v6529_v53, %s6239_s20 }
 0x3d0   : > { %6093 = vrot.lane.b32.xlu1 %v6741_v8, %s6239_s20 }
 0x3d3   : > { %6113 = vrot.lane.b32.xlu0 %v6529_v53, %s6240_s21 }
 0x3d4   : > { %6103 = vrot.lane.b32.xlu1 %v6751_v11, %s6239_s20 }
 0x3d8   : > { %6108 = vrot.lane.b32.xlu1 %v6741_v8, %s6240_s21 }
 0x3dc   : > { %6118 = vrot.lane.b32.xlu1 %v6751_v11, %s6240_s21 }
 0x3e0   : > { %6123 = vrot.lane.b32.xlu1 %v6741_v8, %s6241_s22 }
 0x435   : > { %v3410_v12 = vpop.permute.xlu0 %3409 }
 0x436   : > { %3420 = vst.msk [vmem:[#allocation2 + $0x30] sm:$0xff] %vm1863_vm11, %v3410_v12  ;;  %v3412_v13 = vpop.permute.xlu1 %3411 }
 0x437   : > { %v6773_v14 = vsel %vm1857_vm12, %v3410_v12, %v3412_v13 }
 0x439   : > { %v3414_v15 = vpop.permute.xlu0 %3413 }
 0x43a   : > { %v3416_v16 = vsel %vm1857_vm12, %v3412_v13, %v3414_v15  ;;  %v6079_v17 = vpop.permute.xlu1 %6078 }
 0x43b   : > { %3422 = vst.msk [vmem:[#allocation2 + $0x40] sm:$0xff] %vm1866_vm13, %v3416_v16  ;;  %v6081_v18 = vunpack.i.h.bf16 %v6079_v17  ;;  %v6080_v19 = vunpack.i.l.bf16 %v6079_v17 }
 0x43d   : > { %v6084_v20 = vpop.permute.xlu0 %6083  ;;  %v6777_v21 = vld [vmem:[#allocation2 + $0x30] sm:$0xff]  ;;  %v3463_v1 = vsel %vm395_vm2, %v6080_v19, %v6081_v18 }
 0x43e   : > { %v6086_v22 = vunpack.i.h.bf16 %v6084_v20  ;;  %v6085_v23 = vunpack.i.l.bf16 %v6084_v20  ;;  %3456 = vrot.lane.b32.xlu0 %v6777_v21, %s6237_s19  ;;  %v6089_v24 = vpop.permute.xlu1 %6088  ;;  %v5434_v20 = vld [vmem:[%s7130_s6 + $0x10] sm:$0xff] }
 0x43f   : > { %v6091_v25 = vunpack.i.h.bf16 %v6089_v24  ;;  %v6090_v4 = vunpack.i.l.bf16 %v6089_v24 }
 0x440   : > { %v5813_v26 = vpack.c.bf16 %v6086_v22, %v6081_v18  ;;  %v3465_v27 = vsel %vm395_vm2, %v6085_v23, %v6086_v22 }
 0x441   : > { %v3464_v29 = vsel %vm395_vm2, %v6091_v25, %v6085_v23  ;;  %v3462_v30 = vsel %vm395_vm2, %v6090_v4, %v6080_v19  ;;  %v5808_v31 = vpack.c.bf16 %v3465_v27, %v3463_v1  ;;  %v6099_v39 = vpop.permute.xlu0 %6098 }
 0x442   : > { %v5810_v2 = vpack.c.bf16 %v3464_v29, %v3462_v30  ;;  %3780 = vrot.lane.b32.xlu0 %v6777_v21, %s6239_s20  ;;  %5814 = vmatpush3.bf16.msra.mxu1 %v5813_v26  ;;  %v6787_v32 = vld [vmem:[#allocation2 + $0x40] sm:$0xff]  ;;  %v6094_v36 = vpop.permute.xlu1 %6093  ;;  %v6101_v48 = vunpack.i.h.bf16 %v6099_v39  ;;  %v6100_v58 = vunpack.i.l.bf16 %v6099_v39 }
 0x443   : > { %3460 = vrot.lane.b32.xlu1 %v6787_v32, %s6237_s19  ;;  %5809 = vmatprep.subr.bf16.mxu0 %v5808_v31  ;;  %v6096_v51 = vunpack.i.h.bf16 %v6094_v36  ;;  %v6095_v59 = vunpack.i.l.bf16 %v6094_v36 }
 0x444   : > { %5811 = vmatpush1.bf16.msra.mxu0 %v5810_v2  ;;  %5657 = vmatprep.subr.mxu1 %v6791_v33  ;;  %v3789_v47 = vsel %vm698_vm4, %v6100_v58, %v6101_v48 }
 0x445   : > { %v6871_v42 = vpop.permute.xlu0 %6113  ;;  %v5827_v56 = vpack.c.bf16 %v6101_v48, %v6096_v51  ;;  %v3787_v13 = vsel %vm698_vm4, %v6095_v59, %v6096_v51 }
 0x446   : > { %3962 = vrot.lane.b32.xlu0 %v6777_v21, %s6240_s21  ;;  %v6104_v37 = vpop.permute.xlu1 %6103  ;;  %v6116_v15 = vunpack.i.h.bf16 %v6871_v42  ;;  %v5822_v19 = vpack.c.bf16 %v3789_v47, %v3787_v13  ;;  %v6115_v25 = vunpack.i.l.bf16 %v6871_v42 }
 0x447   : > { %6133 = vrot.lane.b32.xlu1 %v6751_v11, %s6241_s22  ;;  %v6106_v5 = vunpack.i.h.bf16 %v6104_v37  ;;  %v6105_v9 = vunpack.i.l.bf16 %v6104_v37 }
 0x448   : > { %v3971_v36 = vsel %vm859_vm5, %v6115_v25, %v6116_v15 }
 0x449   : > { %v3788_v16 = vsel %vm698_vm4, %v6106_v5, %v6100_v58  ;;  %v3786_v17 = vsel %vm698_vm4, %v6105_v9, %v6095_v59  ;;  %v5440_v9 = vld [vmem:[%s7130_s6 + $0x20] sm:$0xff] }
 0x44a   : > { %3458 = vrot.lane.b32.xlu0 %v6773_v14, %s6237_s19  ;;  %v6867_v38 = vpop.permute.xlu1 %6108  ;;  %v5824_v24 = vpack.c.bf16 %v3788_v16, %v3786_v17 }
 0x44b   : > { %6138 = vrot.lane.b32.xlu1 %v6741_v8, %s6242_s23  ;;  %v6111_v50 = vunpack.i.h.bf16 %v6867_v38  ;;  %v6110_v1 = vunpack.i.l.bf16 %v6867_v38 }
 0x44d   : > { %v5834_v23 = vpack.c.bf16 %v6116_v15, %v6111_v50  ;;  %v3969_v31 = vsel %vm859_vm5, %v6110_v1, %v6111_v50 }
 0x44e   : > { %6128 = vrot.lane.b32.xlu0 %v6529_v53, %s6241_s22  ;;  %v6869_v40 = vpop.permute.xlu1 %6118 }
 0x44f   : > { %6148 = vrot.lane.b32.xlu1 %v6751_v11, %s6242_s23  ;;  %v6121_v4 = vunpack.i.h.bf16 %v6869_v40  ;;  %v6120_v27 = vunpack.i.l.bf16 %v6869_v40 }
 0x451   : > { %v3970_v2 = vsel %vm859_vm5, %v6121_v4, %v6115_v25  ;;  %v3968_v37 = vsel %vm859_vm5, %v6120_v27, %v6110_v1  ;;  %v5443_v27 = vld [vmem:[%s7130_s6 + $0x28] sm:$0xff] }
 0x452   : > { %4144 = vrot.lane.b32.xlu0 %v6777_v21, %s6241_s22  ;;  %v6873_v43 = vpop.permute.xlu1 %6123  ;;  %v5831_v48 = vpack.c.bf16 %v3970_v2, %v3968_v37 }
 0x453   : > { %3784 = vrot.lane.b32.xlu1 %v6787_v32, %s6239_s20  ;;  %v6126_v38 = vunpack.i.h.bf16 %v6873_v43  ;;  %v6125_v51 = vunpack.i.l.bf16 %v6873_v43 }
 0x456   : > { %6143 = vrot.lane.b32.xlu0 %v6529_v53, %s6242_s23 }
 0x457   : > { %6153 = vrot.lane.b32.xlu1 %v6741_v8, %s6243_s24 }
 0x45a   : > { %3782 = vrot.lane.b32.xlu0 %v6773_v14, %s6239_s20 }
 0x45b   : > { %3966 = vrot.lane.b32.xlu1 %v6787_v32, %s6240_s21 }
 0x45e   : > { %4326 = vrot.lane.b32.xlu0 %v6777_v21, %s6242_s23 }
 0x45f   : > { %6163 = vrot.lane.b32.xlu1 %v6751_v11, %s6243_s24 }
 0x462   : > { %3964 = vrot.lane.b32.xlu0 %v6773_v14, %s6240_s21 }
 0x463   : > { %4148 = vrot.lane.b32.xlu1 %v6787_v32, %s6241_s22 }
 0x466   : > { %6158 = vrot.lane.b32.xlu0 %v6529_v53, %s6243_s24 }
 0x467   : > { %6168 = vrot.lane.b32.xlu1 %v6741_v8, %s6244_s25 }
 0x46a   : > { %4146 = vrot.lane.b32.xlu0 %v6773_v14, %s6241_s22 }
 0x46b   : > { %4330 = vrot.lane.b32.xlu1 %v6787_v32, %s6242_s23 }
 0x46e   : > { %4508 = vrot.lane.b32.xlu0 %v6777_v21, %s6243_s24 }
 0x46f   : > { %6178 = vrot.lane.b32.xlu1 %v6751_v11, %s6244_s25 }
 0x472   : > { %4328 = vrot.lane.b32.xlu0 %v6773_v14, %s6242_s23 }
 0x473   : > { %4512 = vrot.lane.b32.xlu1 %v6787_v32, %s6243_s24 }
 0x476   : > { %6173 = vrot.lane.b32.xlu0 %v6529_v53, %s6244_s25 }
 0x477   : > { %6183 = vrot.lane.b32.xlu1 %v6741_v8, %s6245_s26 }
 0x47a   : > { %4510 = vrot.lane.b32.xlu0 %v6773_v14, %s6243_s24 }
 0x47b   : > { %4694 = vrot.lane.b32.xlu1 %v6787_v32, %s6244_s25 }
 0x47e   : > { %4690 = vrot.lane.b32.xlu0 %v6777_v21, %s6244_s25 }
 0x47f   : > { %6193 = vrot.lane.b32.xlu1 %v6751_v11, %s6245_s26 }
 0x482   : > { %4692 = vrot.lane.b32.xlu0 %v6773_v14, %s6244_s25 }
 0x483   : > { %4876 = vrot.lane.b32.xlu1 %v6787_v32, %s6245_s26 }
 0x486   : > { %6188 = vrot.lane.b32.xlu0 %v6529_v53, %s6245_s26 }
 0x487   : > { %5043 = vperm.xlu1 %6076, %v5040_v35  }
 0x48a   : > { %4874 = vrot.lane.b32.xlu0 %v6773_v14, %s6245_s26 }
 0x48e   : > { %4872 = vrot.lane.b32.xlu0 %v6777_v21, %s6245_s26 }
 0x4b0   : > { %v3457_v0 = vpop.permute.xlu0 %3456 }
 0x4b4   : > { %v6875_v53 = vpop.permute.xlu0 %3780 }
 0x4b5   : > { %v3461_v45 = vpop.permute.xlu1 %3460 }
 0x4b6   : > { %5658 = vmatpush3.msra.mxu1 %v3461_v45 }
 0x4b7   : > { %5819 = vmatprep.subr.bf16.mxu1 %v6248_v49  ;;  %5660 = vmatmul.mubr.msk.f32.vlgmr.msra.gmra.mrb[36].mxu1 %vm3477_vm15, %v5429_v44 }
 0x4b8   : > { %v6884_v54 = vpop.permute.xlu0 %3962  ;;  %5821 = vmatpush3.bf16.msra.mxu1 %v5820_v46  ;;  %5668 = vmatprep.mubr.msk.f32.mxu1 %vm6238_vm1, %v6791_v33 }
 0x4b9   : > { %v6888_v55 = vpop.permute.xlu1 %6133  ;;  %5666 = vmatprep.subr.mxu1 %v6791_v33 }
 0x4bc   : > { %v3459_v57 = vpop.permute.xlu0 %3458  ;;  %5667 = vmatpush3.msra.mxu1 %v6787_v32 }
 0x4bd   : > { %v3466_v60 = vsel %vm395_vm2, %v3457_v0, %v3459_v57  ;;  %v6896_v61 = vpop.permute.xlu1 %6138  ;;  %5826 = vmatprep.subr.bf16.mxu1 %v6248_v49  ;;  %v3467_v62 = vsel %vm395_vm2, %v3459_v57, %v3461_v45  ;;  %5669 = vmatmul.mubr.msk.f32.vlgmr.msra.gmra.mrb[38].mxu1 %vm3477_vm15, %v3432_v52  ;;  %v5437_v0 = vld [vmem:[%s7130_s6 + $0x18] sm:$0xff]  ;;  %v6135_v57 = vunpack.i.l.bf16 %v6888_v55 }
 0x4be   : > { %3485 = vmatprep.subr.mxu0 %v3467_v62  ;;  %5828 = vmatpush3.bf16.msra.mxu1 %v5827_v56  ;;  %v6136_v56 = vunpack.i.h.bf16 %v6888_v55  ;;  %v6141_v62 = vunpack.i.h.bf16 %v6896_v61  ;;  %v6140_v17 = vunpack.i.l.bf16 %v6896_v61 }
 0x4bf   : > { %3486 = vmatpush1.msra.mxu0 %v3466_v60  ;;  %5675 = vmatprep.subr.mxu1 %v6791_v33  ;;  %v4151_v60 = vsel %vm1020_vm6, %v6125_v51, %v6126_v38  ;;  %v4150_v13 = vsel %vm1020_vm6, %v6135_v57, %v6125_v51 }
 0x4c0   : > { %v6906_v11 = vpop.permute.xlu0 %6128  ;;  %5430 = vmatmul.mubr.msk.f32.vlgmr.msra.gmra.mrb[4].mxu0 %vm3477_vm15, %v5429_v44  ;;  %5816 = vmatprep.subr.bf16.mxu0 %v5815_v63  ;;  %v5829_v44 = vpack.c.bf16 %v3971_v36, %v3969_v31  ;;  %v4333_v1 = vsel %vm1181_vm7, %v6140_v17, %v6141_v62 }
 0x4c1   : > { %v6909_v12 = vpop.permute.xlu1 %6148  ;;  %5818 = vmatpush1.bf16.msra.mxu0 %v5817_v3  ;;  %3689 = vmatprep.mubr.f32.mxu0 %v6791_v33  ;;  %v6131_v30 = vunpack.i.h.bf16 %v6906_v11  ;;  %v6130_v45 = vunpack.i.l.bf16 %v6906_v11 }
 0x4c2   : > { %3629 = vmatprep.subr.mxu0 %v6773_v14  ;;  %5677 = vmatprep.mubr.msk.f32.mxu1 %vm6238_vm1, %v6791_v33 }
 0x4c3   : > { %v5841_v46 = vpack.c.bf16 %v6131_v30, %v6126_v38  ;;  %v4153_v43 = vsel %vm1020_vm6, %v6130_v45, %v6131_v30  ;;  %v4152_v63 = vsel %vm1020_vm6, %v6136_v56, %v6130_v45 }
 0x4c4   : > { %v6921_v18 = vpop.permute.xlu0 %4144  ;;  %v5836_v11 = vpack.c.bf16 %v4153_v43, %v4151_v60  ;;  %v5838_v15 = vpack.c.bf16 %v4152_v63, %v4150_v13 }
 0x4c5   : > { %v3785_v22 = vpop.permute.xlu1 %3784  ;;  %3630 = vmatpush1.msra.mxu0 %v6777_v21 }
 0x4c6   : > { %5823 = vmatprep.subr.bf16.mxu0 %v5822_v19  ;;  %5676 = vmatpush3.msra.mxu1 %v3785_v22  ;;  %v6151_v19 = vunpack.i.h.bf16 %v6909_v12 }
 0x4c7   : > { %5833 = vmatprep.subr.bf16.mxu1 %v6248_v49  ;;  %5678 = vmatmul.mubr.msk.f32.vlgmr.msra.gmra.mrb[40].mxu1 %vm3477_vm15, %v5434_v20 }
 0x4c8   : > { %v6932_v26 = vpop.permute.xlu0 %6143  ;;  %5432 = vmatmul.mubr.msk.f32.vlgmr.msra.gmra.mrb[4].mxu0 %vm3477_vm15, %v3432_v52  ;;  %5835 = vmatpush3.bf16.msra.mxu1 %v5834_v23 }
 0x4c9   : > { %5825 = vmatpush1.bf16.msra.mxu0 %v5824_v24  ;;  %v6936_v29 = vpop.permute.xlu1 %6153  ;;  %5684 = vmatprep.subr.mxu1 %v6791_v33  ;;  %v6146_v58 = vunpack.i.h.bf16 %v6932_v26  ;;  %v6145_v47 = vunpack.i.l.bf16 %v6932_v26 }
 0x4ca   : > { %5686 = vmatprep.mubr.msk.f32.mxu1 %vm6238_vm1, %v6791_v33  ;;  %3868 = vmatprep.mubr.f32.mxu0 %v6791_v33  ;;  %v6156_v25 = vunpack.i.h.bf16 %v6936_v29 }
 0x4cb   : > { %v5848_v50 = vpack.c.bf16 %v6146_v58, %v6141_v62  ;;  %v4335_v23 = vsel %vm1181_vm7, %v6145_v47, %v6146_v58  ;;  %v4334_v61 = vsel %vm1181_vm7, %v6151_v19, %v6145_v47 }
 0x4cc   : > { %v3783_v35 = vpop.permute.xlu0 %3782  ;;  %v5843_v30 = vpack.c.bf16 %v4335_v23, %v4333_v1 }
 0x4cd   : > { %v3790_v39 = vsel %vm698_vm4, %v6875_v53, %v3783_v35  ;;  %v3967_v40 = vpop.permute.xlu1 %3966  ;;  %v3791_v42 = vsel %vm698_vm4, %v3783_v35, %v3785_v22 }
 0x4ce   : > { %3808 = vmatprep.subr.mxu0 %v3791_v42  ;;  %5685 = vmatpush3.msra.mxu1 %v3967_v40 }
 0x4cf   : > { %3809 = vmatpush1.msra.mxu0 %v3790_v39  ;;  %5840 = vmatprep.subr.bf16.mxu1 %v6248_v49 }
 0x4d0   : > { %v6957_v53 = vpop.permute.xlu0 %4326  ;;  %5830 = vmatprep.subr.bf16.mxu0 %v5829_v44  ;;  %5687 = vmatmul.mubr.msk.f32.vlgmr.msra.gmra.mrb[42].mxu1 %vm3477_vm15, %v5437_v0 }
 0x4d1   : > { %5842 = vmatpush3.bf16.msra.mxu1 %v5841_v46  ;;  %v6960_v52 = vpop.permute.xlu1 %6163  ;;  %5435 = vmatmul.mubr.msk.f32.vlgmr.msra.gmra.mrb[4].mxu0 %vm3477_vm15, %v5434_v20  ;;  %v6150_v20 = vunpack.i.l.bf16 %v6909_v12 }
 0x4d2   : > { %5832 = vmatpush1.bf16.msra.mxu0 %v5831_v48  ;;  %5693 = vmatprep.subr.mxu1 %v6791_v33  ;;  %v6166_v39 = vunpack.i.h.bf16 %v6960_v52 }
 0x4d3   : > { %5695 = vmatprep.mubr.msk.f32.mxu1 %vm6238_vm1, %v6791_v33  ;;  %4050 = vmatprep.mubr.f32.mxu0 %v6791_v33  ;;  %v4332_v31 = vsel %vm1181_vm7, %v6150_v20, %v6140_v17  ;;  %v5449_v17 = vld [vmem:[%s7130_s6 + $0x38] sm:$0xff] }
 0x4d4   : > { %v3965_v59 = vpop.permute.xlu0 %3964  ;;  %v5845_v36 = vpack.c.bf16 %v4334_v61, %v4332_v31 }
 0x4d5   : > { %v3972_v3 = vsel %vm859_vm5, %v6884_v54, %v3965_v59  ;;  %v4149_v55 = vpop.permute.xlu1 %4148  ;;  %v3973_v5 = vsel %vm859_vm5, %v3965_v59, %v3967_v40  ;;  %v6165_v40 = vunpack.i.l.bf16 %v6960_v52 }
 0x4d6   : > { %3990 = vmatprep.subr.mxu0 %v3973_v5  ;;  %5694 = vmatpush3.msra.mxu1 %v4149_v55 }
 0x4d7   : > { %3991 = vmatpush1.msra.mxu0 %v3972_v3  ;;  %5847 = vmatprep.subr.bf16.mxu1 %v6248_v49 }
 0x4d8   : > { %v6159_v54 = vpop.permute.xlu0 %6158  ;;  %5837 = vmatprep.subr.bf16.mxu0 %v5836_v11  ;;  %5696 = vmatmul.mubr.msk.f32.vlgmr.msra.gmra.mrb[44].mxu1 %vm3477_vm15, %v5440_v9 }
 0x4d9   : > { %5849 = vmatpush3.bf16.msra.mxu1 %v5848_v50  ;;  %v6984_v16 = vpop.permute.xlu1 %6168  ;;  %5438 = vmatmul.mubr.msk.f32.vlgmr.msra.gmra.mrb[4].mxu0 %vm3477_vm15, %v5437_v0  ;;  %v6161_v22 = vunpack.i.h.bf16 %v6159_v54  ;;  %v6160_v2 = vunpack.i.l.bf16 %v6159_v54 }
 0x4da   : > { %5839 = vmatpush1.bf16.msra.mxu0 %v5838_v15  ;;  %5702 = vmatprep.subr.mxu1 %v6791_v33  ;;  %v6170_v43 = vunpack.i.l.bf16 %v6984_v16 }
 0x4db   : > { %5704 = vmatprep.mubr.msk.f32.mxu1 %vm6238_vm1, %v6791_v33  ;;  %4232 = vmatprep.mubr.f32.mxu0 %v6791_v33  ;;  %v5855_v35 = vpack.c.bf16 %v6161_v22, %v6156_v25  ;;  %v4517_v42 = vsel %vm1342_vm8, %v6160_v2, %v6161_v22  ;;  %v4516_v44 = vsel %vm1342_vm8, %v6166_v39, %v6160_v2 }
 0x4dc   : > { %v4147_v24 = vpop.permute.xlu0 %4146 }
 0x4dd   : > { %v4154_v4 = vsel %vm1020_vm6, %v6921_v18, %v4147_v24  ;;  %v4331_v26 = vpop.permute.xlu1 %4330  ;;  %v4155_v12 = vsel %vm1020_vm6, %v4147_v24, %v4149_v55  ;;  %v6155_v18 = vunpack.i.l.bf16 %v6936_v29  ;;  %v5446_v29 = vld [vmem:[%s7130_s6 + $0x30] sm:$0xff] }
 0x4de   : > { %4172 = vmatprep.subr.mxu0 %v4155_v12  ;;  %5703 = vmatpush3.msra.mxu1 %v4331_v26 }
 0x4df   : > { %4173 = vmatpush1.msra.mxu0 %v4154_v4  ;;  %5854 = vmatprep.subr.bf16.mxu1 %v6248_v49  ;;  %v4515_v51 = vsel %vm1342_vm8, %v6155_v18, %v6156_v25  ;;  %v4514_v56 = vsel %vm1342_vm8, %v6165_v40, %v6155_v18 }
 0x4e0   : > { %v4509_v37 = vpop.permute.xlu0 %4508  ;;  %5844 = vmatprep.subr.bf16.mxu0 %v5843_v30  ;;  %5705 = vmatmul.mubr.msk.f32.vlgmr.msra.gmra.mrb[46].mxu1 %vm3477_vm15, %v5443_v27  ;;  %v5850_v52 = vpack.c.bf16 %v4517_v42, %v4515_v51  ;;  %v5852_v57 = vpack.c.bf16 %v4516_v44, %v4514_v56 }
 0x4e1   : > { %5856 = vmatpush3.bf16.msra.mxu1 %v5855_v35  ;;  %v6179_v38 = vpop.permute.xlu1 %6178  ;;  %5441 = vmatmul.mubr.msk.f32.vlgmr.msra.gmra.mrb[4].mxu0 %vm3477_vm15, %v5440_v9 }
 0x4e2   : > { %5846 = vmatpush1.bf16.msra.mxu0 %v5845_v36  ;;  %5711 = vmatprep.subr.mxu1 %v6791_v33  ;;  %v6181_v63 = vunpack.i.h.bf16 %v6179_v38  ;;  %v6180_v3 = vunpack.i.l.bf16 %v6179_v38 }
 0x4e3   : > { %5713 = vmatprep.mubr.msk.f32.mxu1 %vm6238_vm1, %v6791_v33  ;;  %4414 = vmatprep.mubr.f32.mxu0 %v6791_v33 }
 0x4e4   : > { %v4329_v0 = vpop.permute.xlu0 %4328 }
 0x4e5   : > { %v4336_v45 = vsel %vm1181_vm7, %v6957_v53, %v4329_v0  ;;  %v4513_v46 = vpop.permute.xlu1 %4512  ;;  %v4337_v48 = vsel %vm1181_vm7, %v4329_v0, %v4331_v26  ;;  %v6171_v53 = vunpack.i.h.bf16 %v6984_v16  ;;  %v4696_v16 = vsel %vm1503_vm9, %v6180_v3, %v6170_v43  ;;  %v5452_v0 = vld [vmem:[%s7130_s6 + $0x40] sm:$0xff] }
 0x4e6   : > { %4354 = vmatprep.subr.mxu0 %v4337_v48  ;;  %5712 = vmatpush3.msra.mxu1 %v4513_v46 }
 0x4e7   : > { %4355 = vmatpush1.msra.mxu0 %v4336_v45  ;;  %5714 = vmatmul.mubr.msk.f32.vlgmr.msra.gmra.mrb[48].mxu1 %vm3477_vm15, %v5446_v29  ;;  %v4697_v50 = vsel %vm1503_vm9, %v6170_v43, %v6171_v53 }
 0x4e8   : > { %v6174_v58 = vpop.permute.xlu0 %6173  ;;  %5851 = vmatprep.subr.bf16.mxu0 %v5850_v52  ;;  %5861 = vmatprep.subr.bf16.mxu1 %v6248_v49 }
 0x4e9   : > { %v6176_v59 = vunpack.i.h.bf16 %v6174_v58  ;;  %v6175_v60 = vunpack.i.l.bf16 %v6174_v58  ;;  %v6184_v62 = vpop.permute.xlu1 %6183  ;;  %5444 = vmatmul.mubr.msk.f32.vlgmr.msra.gmra.mrb[4].mxu0 %vm3477_vm15, %v5443_v27  ;;  %5722 = vmatprep.mubr.msk.f32.mxu1 %vm6238_vm1, %v6791_v33 }
 0x4ea   : > { %5853 = vmatpush1.bf16.msra.mxu0 %v5852_v57  ;;  %4596 = vmatprep.mubr.f32.mxu0 %v6791_v33  ;;  %v6186_v61 = vunpack.i.h.bf16 %v6184_v62  ;;  %v6185_v25 = vunpack.i.l.bf16 %v6184_v62 }
 0x4eb   : > { %v5862_v55 = vpack.c.bf16 %v6176_v59, %v6171_v53  ;;  %v4699_v5 = vsel %vm1503_vm9, %v6175_v60, %v6176_v59  ;;  %v4698_v11 = vsel %vm1503_vm9, %v6181_v63, %v6175_v60 }
 0x4ec   : > { %v4511_v9 = vpop.permute.xlu0 %4510  ;;  %v5857_v54 = vpack.c.bf16 %v4699_v5, %v4697_v50  ;;  %v5859_v19 = vpack.c.bf16 %v4698_v11, %v4696_v16  ;;  %v4879_v31 = vsel %vm1664_vm10, %v6185_v25, %v6186_v61 }
 0x4ed   : > { %v4518_v13 = vsel %vm1342_vm8, %v4509_v37, %v4511_v9  ;;  %5863 = vmatpush3.bf16.msra.mxu1 %v5862_v55  ;;  %v4519_v47 = vsel %vm1342_vm8, %v4511_v9, %v4513_v46  ;;  %v4695_v15 = vpop.permute.xlu1 %4694 }
 0x4ee   : > { %4536 = vmatprep.subr.mxu0 %v4519_v47  ;;  %5720 = vmatprep.subr.mxu1 %v6791_v33 }
 0x4ef   : > { %4537 = vmatpush1.msra.mxu0 %v4518_v13 }
 0x4f0   : > { %v4691_v20 = vpop.permute.xlu0 %4690  ;;  %5858 = vmatprep.subr.bf16.mxu0 %v5857_v54 }
 0x4f1   : > { %5447 = vmatmul.mubr.msk.f32.vlgmr.msra.gmra.mrb[4].mxu0 %vm3477_vm15, %v5446_v29  ;;  %5721 = vmatpush3.msra.mxu1 %v4695_v15  ;;  %v6194_v22 = vpop.permute.xlu1 %6193 }
 0x4f2   : > { %5860 = vmatpush1.bf16.msra.mxu0 %v5859_v19  ;;  %5723 = vmatmul.mubr.msk.f32.vlgmr.msra.gmra.mrb[50].mxu1 %vm3477_vm15, %v5449_v17  ;;  %v6195_v4 = vunpack.i.l.bf16 %v6194_v22  ;;  %v6196_v12 = vunpack.i.h.bf16 %v6194_v22 }
 0x4f3   : > { %4778 = vmatprep.mubr.f32.mxu0 %v6791_v33  ;;  %5868 = vmatprep.subr.bf16.mxu1 %v6248_v49 }
 0x4f4   : > { %v4693_v23 = vpop.permute.xlu0 %4692  ;;  %5731 = vmatprep.mubr.msk.f32.mxu1 %vm6238_vm1, %v6791_v33  ;;  %v4878_v2 = vsel %vm1664_vm10, %v6195_v4, %v6185_v25 }
 0x4f5   : > { %v4700_v24 = vsel %vm1503_vm9, %v4691_v20, %v4693_v23  ;;  %v4701_v1 = vsel %vm1503_vm9, %v4693_v23, %v4695_v15  ;;  %v4877_v40 = vpop.permute.xlu1 %4876 }
 0x4f6   : > { %4718 = vmatprep.subr.mxu0 %v4701_v1 }
 0x4f7   : > { %4719 = vmatpush1.msra.mxu0 %v4700_v24 }
 0x4f8   : > { %v6189_v26 = vpop.permute.xlu0 %6188 }
 0x4f9   : > { %v6191_v27 = vunpack.i.h.bf16 %v6189_v26  ;;  %v6190_v30 = vunpack.i.l.bf16 %v6189_v26  ;;  %5450 = vmatmul.mubr.msk.f32.vlgmr.msra.gmra.mrb[4].mxu0 %vm3477_vm15, %v5449_v17 }
 0x4fa   : > { %4960 = vmatprep.mubr.f32.mxu0 %v6791_v33 }
 0x4fb   : > { %v4880_v35 = vsel %vm1664_vm10, %v6196_v12, %v6190_v30  ;;  %v5869_v36 = vpack.c.bf16 %v6191_v27, %v6186_v61  ;;  %v4881_v37 = vsel %vm1664_vm10, %v6190_v30, %v6191_v27  ;;  %v5076_v27 = vld [vmem:[#allocation2 + $0x20] sm:$0xff]  ;;  %v5077_v30 = vld [vmem:[#allocation2 + $0x28] sm:$0xff] }
 0x4fc   : > { %v5866_v18 = vpack.c.bf16 %v4880_v35, %v4878_v2  ;;  %v4875_v38 = vpop.permute.xlu0 %4874  ;;  %v5864_v39 = vpack.c.bf16 %v4881_v37, %v4879_v31  ;;  %v5075_v31 = vld [vmem:[#allocation2 + $0x18] sm:$0xff]  ;;  %v6202_v2 = vpack.i.bf16 %v5077_v30, %v5076_v27 }
 0x4fd   : > { %5870 = vmatpush3.bf16.msra.mxu1 %v5869_v36  ;;  %v4883_v42 = vsel %vm1664_vm10, %v4875_v38, %v4877_v40  ;;  %v6207_v35 = vpack.i.bf16 %v5075_v31, %v6745_v10 }
 0x4fe   : > { %5865 = vmatprep.subr.bf16.mxu0 %v5864_v39  ;;  %5729 = vmatprep.subr.mxu1 %v6791_v33 }
 0x4ff   : > { %5867 = vmatpush1.bf16.msra.mxu0 %v5866_v18 }
 0x500   : > { %v4873_v29 = vpop.permute.xlu0 %4872  ;;  %4900 = vmatprep.subr.mxu0 %v4883_v42 }
 0x501   : > { %v4882_v44 = vsel %vm1664_vm10, %v4873_v29, %v4875_v38  ;;  %5730 = vmatpush3.msra.mxu1 %v4877_v40 }
 0x502   : > { %5732 = vmatmul.mubr.msk.f32.vlgmr.msra.gmra.mrb[52].mxu1 %vm3477_vm15, %v5452_v0  ;;  %5879 = vmatprep.subr.bf16.mxu1 %v6248_v49 }
 0x503   : > { %4901 = vmatpush1.msra.mxu0 %v4882_v44  ;;  %5742 = vmatprep.mubr.msk.f32.mxu1 %vm6238_vm1, %v6791_v33 }
 0x504   : > { %5453 = vmatmul.mubr.msk.f32.vlgmr.msra.gmra.mrb[4].mxu0 %vm3477_vm15, %v5452_v0 }
 0x505   : > { %5215 = vmatprep.mubr.f32.mxu0 %v6791_v33 }
 0x506   : > { %v5044_v17 = vpop.permute.xlu1 %5043 }
 0x58a   : > { %v3618_v45 = vpop.f32.mrb[36].mxu1 }
 0x58b   : > { %v5661_v46 = vpop.f32.mrb[37].mxu1 }
 0x590   : > { %v3762_v48 = vpop.f32.mrb[38].mxu1 }
 0x591   : > { %v3763_v51 = vadd.f32 %v3762_v48, %v3618_v45  ;;  %v5670_v52 = vpop.f32.mrb[39].mxu1 }
 0x59a   : > { %v3941_v56 = vpop.f32.mrb[40].mxu1 }
 0x59b   : > { %v3947_v57 = vadd.f32 %v3941_v56, %v3763_v51  ;;  %v5679_v58 = vpop.f32.mrb[41].mxu1 }
 0x5a3   : > { %v4123_v53 = vpop.f32.mrb[42].mxu1 }
 0x5a4   : > { %v4129_v43 = vadd.f32 %v4123_v53, %v3947_v57  ;;  %v5688_v59 = vpop.f32.mrb[43].mxu1 }
 0x5ab   : > { %v4305_v60 = vpop.f32.mrb[44].mxu1 }
 0x5ac   : > { %v4311_v62 = vadd.f32 %v4305_v60, %v4129_v43  ;;  %v5697_v63 = vpop.f32.mrb[45].mxu1 }
 0x5b3   : > { %v4487_v3 = vpop.f32.mrb[46].mxu1 }
 0x5b4   : > { %v4493_v55 = vadd.f32 %v4487_v3, %v4311_v62  ;;  %v5706_v5 = vpop.f32.mrb[47].mxu1 }
 0x5ba   : > { %v4669_v9 = vpop.f32.mrb[48].mxu1 }
 0x5bb   : > { %v4675_v11 = vadd.f32 %v4669_v9, %v4493_v55  ;;  %v5715_v33 = vpop.f32.mrb[49].mxu1 }
 0x5c5   : > { %v4851_v13 = vpop.f32.mrb[50].mxu1 }
 0x5c6   : > { %v4857_v47 = vadd.f32 %v4851_v13, %v4675_v11  ;;  %v5724_v50 = vpop.f32.mrb[51].mxu1 }
 0x5c7   : > { %v5084_v50 = vld [vmem:[%s7132_s8] sm:$0xff] }
 0x5d5   : > { %v5033_v15 = vpop.f32.mrb[52].mxu1 }
 0x5d6   : > { %v5039_v54 = vadd.f32 %v5033_v15, %v4857_v47  ;;  %v5733_v16 = vpop.f32.mrb[53].mxu1 }
 0x5d7   : > { %v4962_v19 = vpop.f32.mrb[4].mxu0 }
 0x5d8   : > { %v5048_v20 = vadd.f32 %v5044_v17, %v5039_v54  ;;  %v5046_v22 = vadd.f32 %v5044_v17, %v4962_v19  ;;  %v4964_v23 = vpop.f32.mrb[5].mxu0 }
 0x5d9   : > { %v5047_v24 = vadd.f32 %v5044_v17, %v4964_v23 }
 0x5da   : > { %v5049_v1 = vmax.f32 %v5046_v22, 0.0  ;;  %v5051_v25 = vmax.f32 %v5048_v20, 0.0 }
 0x5db   : > { %v5050_v61 = vmax.f32 %v5047_v24, 0.0 }
 0x5dc   : > { %v5052_v4 = vmul.f32 %v5049_v1, %v6501_v34  ;;  %v5054_v12 = vmul.f32 %v5051_v25, %v6497_v28  ;;  %v6212_v34 = vpack.i.bf16 %v6787_v32, %v6773_v14 }
 0x5dd   : > { %v5053_v26 = vmul.f32 %v5050_v61, %v6504_v41 }
 0x5de   : > { %5058 = vrot.lane.b32.xlu0 %v5052_v4, %s6247_s11 }
 0x5df   : > { %5060 = vrot.lane.b32.xlu1 %v5053_v26, %s6247_s11 }
 0x5e2   : > { %5062 = vrot.lane.b32.xlu0 %v5054_v12, %s6247_s11 }
 0x5e3   : > { %6198 = vrot.lane.b32.xlu1 %v6741_v8, %s6241_s22 }
 0x5e6   : > { %6203 = vrot.lane.b32.xlu0 %v6202_v2, %s6241_s22 }
 0x5e7   : > { %6208 = vrot.lane.b32.xlu1 %v6207_v35, %s6241_s22 }
 0x5ea   : > { %6213 = vrot.lane.b32.xlu0 %v6212_v34, %s6241_s22 }
 0x650   : > { %v5059_v28 = vpop.permute.xlu0 %5058 }
 0x651   : > { %5069 = vst.msk [vmem:[#allocation2 + $0x48] sm:$0xff] %vm1863_vm11, %v5059_v28  ;;  %v5061_v41 = vpop.permute.xlu1 %5060 }
 0x652   : > { %v5064_v36 = vsel %vm1857_vm12, %v5059_v28, %v5061_v41 }
 0x654   : > { %v5063_v37 = vpop.permute.xlu0 %5062 }
 0x655   : > { %v5065_v8 = vsel %vm1857_vm12, %v5061_v41, %v5063_v37  ;;  %v6199_v18 = vpop.permute.xlu1 %6198 }
 0x656   : > { %5071 = vst.msk [vmem:[#allocation2 + $0x58] sm:$0xff] %vm1866_vm13, %v5065_v8  ;;  %v6201_v38 = vunpack.i.h.bf16 %v6199_v18  ;;  %v6200_v39 = vunpack.i.l.bf16 %v6199_v18 }
 0x658   : > { %v6204_v40 = vpop.permute.xlu0 %6203  ;;  %v5081_v42 = vld [vmem:[#allocation2 + $0x48] sm:$0xff]  ;;  %v5128_v44 = vsel %vm1020_vm6, %v6200_v39, %v6201_v38 }
 0x659   : > { %v6206_v0 = vunpack.i.h.bf16 %v6204_v40  ;;  %v6205_v14 = vunpack.i.l.bf16 %v6204_v40  ;;  %v6209_v32 = vpop.permute.xlu1 %6208  ;;  %v6222_v29 = vpack.i.bf16 %v5081_v42, %v6777_v21  ;;  %v5085_v21 = vld [vmem:[%s7133_s9] sm:$0xff] }
 0x65a   : > { %v6211_v45 = vunpack.i.h.bf16 %v6209_v32  ;;  %v6210_v46 = vunpack.i.l.bf16 %v6209_v32 }
 0x65b   : > { %v5880_v48 = vpack.c.bf16 %v6206_v0, %v6201_v38  ;;  %6223 = vrot.lane.b32.xlu0 %v6222_v29, %s6241_s22  ;;  %v5130_v51 = vsel %vm1020_vm6, %v6205_v14, %v6206_v0 }
 0x65c   : > { %v5129_v52 = vsel %vm1020_vm6, %v6211_v45, %v6205_v14  ;;  %v5127_v56 = vsel %vm1020_vm6, %v6210_v46, %v6200_v39  ;;  %v5871_v57 = vpack.c.bf16 %v5130_v51, %v5128_v44  ;;  %v6214_v59 = vpop.permute.xlu0 %6213 }
 0x65d   : > { %v5873_v58 = vpack.c.bf16 %v5129_v52, %v5127_v56  ;;  %5881 = vmatpush3.bf16.msra.mxu1 %v5880_v48  ;;  %v5083_v53 = vld [vmem:[#allocation2 + $0x58] sm:$0xff]  ;;  %v6215_v62 = vunpack.i.l.bf16 %v6214_v59 }
 0x65e   : > { %5872 = vmatprep.subr.bf16.mxu0 %v5871_v57  ;;  %v6217_v43 = vpack.i.bf16 %v5083_v53, %v5064_v36  ;;  %5882 = vmatprep.subr.bf16.mxu1 %v6248_v49  ;;  %v6216_v49 = vunpack.i.h.bf16 %v6214_v59 }
 0x65f   : > { %5874 = vmatpush1.bf16.msra.mxu0 %v5873_v58  ;;  %5298 = vrot.lane.b32.xlu0 %v6745_v10, %s6241_s22 }
 0x660   : > { %6218 = vrot.lane.b32.xlu1 %v6217_v43, %s6241_s22  ;;  %v5132_v9 = vsel %vm1020_vm6, %v6215_v62, %v6216_v49 }
 0x663   : > { %5302 = vrot.lane.b32.xlu0 %v6736_v7, %s6241_s22 }
 0x664   : > { %5088 = vperm.xlu1 %6076, %v5085_v21  }
 0x668   : > { %5300 = vrot.lane.b32.xlu1 %v6734_v6, %s6241_s22 }
 0x6cd   : > { %v6224_v60 = vpop.permute.xlu0 %6223 }
 0x6ce   : > { %v6225_v63 = vunpack.i.l.bf16 %v6224_v60  ;;  %v6226_v10 = vunpack.i.h.bf16 %v6224_v60 }
 0x6d0   : > { %v5131_v11 = vsel %vm1020_vm6, %v6225_v63, %v6215_v62 }
 0x6d1   : > { %v5299_v15 = vpop.permute.xlu0 %5298 }
 0x6d2   : > { %v6219_v3 = vpop.permute.xlu1 %6218 }
 0x6d3   : > { %v6221_v55 = vunpack.i.h.bf16 %v6219_v3  ;;  %v6220_v5 = vunpack.i.l.bf16 %v6219_v3 }
 0x6d5   : > { %v5883_v33 = vpack.c.bf16 %v6221_v55, %v6216_v49  ;;  %v5133_v7 = vsel %vm1020_vm6, %v6226_v10, %v6220_v5  ;;  %v5134_v13 = vsel %vm1020_vm6, %v6220_v5, %v6221_v55  ;;  %v5303_v17 = vpop.permute.xlu0 %5302 }
 0x6d6   : > { %v5877_v47 = vpack.c.bf16 %v5133_v7, %v5131_v11  ;;  %v5875_v6 = vpack.c.bf16 %v5134_v13, %v5132_v9 }
 0x6d7   : > { %5884 = vmatpush3.bf16.msra.mxu1 %v5883_v33 }
 0x6d8   : > { %5876 = vmatprep.subr.bf16.mxu0 %v5875_v6 }
 0x6d9   : > { %5878 = vmatpush1.bf16.msra.mxu0 %v5877_v47 }
 0x6da   : > { %5743 = vmatmul.mubr.msk.f32.vlgmr.msra.gmra.mrb[54].mxu1 %vm5147_vm0, %v5084_v50 }
 0x6dc   : > { %5455 = vmatmul.mubr.msk.f32.vlgmr.msra.gmra.mrb[6].mxu0 %vm5147_vm0, %v5084_v50 }
 0x6e3   : > { %v5089_v54 = vpop.permute.xlu1 %5088 }
 0x6e7   : > { %v5301_v20 = vpop.permute.xlu1 %5300 }
 0x6e8   : > { %v5305_v61 = vsel %vm1020_vm6, %v5301_v20, %v5303_v17  ;;  %v5304_v4 = vsel %vm1020_vm6, %v5299_v15, %v5301_v20 }
 0x7ad   : > { %v5288_v16 = vpop.f32.mrb[54].mxu1 }
 0x7ae   : > { %v5289_v19 = vadd.f32 %v5288_v16, %v5089_v54  ;;  %v5744_v22 = vpop.f32.mrb[55].mxu1 }
 0x7af   : > { %v5217_v23 = vpop.f32.mrb[6].mxu0 }
 0x7b0   : > { %v5311_v24 = vadd.f32 %v5303_v17, %v5289_v19  ;;  %v5218_v1 = vadd.f32 %v5217_v23, %v5089_v54  ;;  %v5219_v25 = vpop.f32.mrb[7].mxu0 }
 0x7b1   : > { %v5220_v26 = vadd.f32 %v5219_v25, %v5089_v54 }
 0x7b2   : > { %5314 = vst.msk [vmem:[%s359_s29 + $0x10] sm:$0xff] %vm5147_vm0, %v5311_v24  ;;  %v5309_v12 = vadd.f32 %v5304_v4, %v5218_v1 }
 0x7b3   : > { %v5310_v27 = vadd.f32 %v5305_v61, %v5220_v26 }
 0x7b4   : > { %5312 = vst [vmem:[%s359_s29] sm:$0xff] %v5309_v12 }
 0x7b5   : > { %5313 = vst [vmem:[%s359_s29 + $0x8] sm:$0xff] %v5310_v27 }
 0x7b6 PF: > { %s20_s13 = sadd.s32 1, %s6234_s13  }
 0x7b7   : > { %p17_p4 = scmp.ge.s32.totalorder %s20_s13, 4  }
 0x7b9   :  { %19 = sbr.rel (!%p17_p4) target bundleno = 1 (0x1), region = 114 }

</bundles_post_ra>
